<compile_context>
chip_gen: v7x
topology: tpu7x:2x2x1
jax: 0.10.0
libtpu: 0.0.40
codegen_flags: <defaults>
</compile_context>

<pallas_src>
import functools
import numpy as np

import jax
import jax.numpy as jnp
from jax import lax
from jax.experimental import pallas as pl
from jax.experimental.pallas import tpu as pltpu


def _cdiv(a, b):
    return -(-a // b)


def _round_up(x, m):
    return ((x + m - 1) // m) * m


def _vmem_capacity_bytes():
    try:
        return int(pltpu.get_tpu_info().vmem_capacity_bytes)
    except Exception:           # conservative fallback (v7x-sized VMEM)
        return 64 << 20


# ----------------------------------------------------------------------------
# Fused kernel.  grid = (batch, layer, query_block); both directions per step.
# ----------------------------------------------------------------------------
def _stacked_kernel(e1_ref, e2_ref, bias1_ref, bias2_ref, w12_ref, w21_ref,
                    *outs_and_scratch,
                    emit_weights, weights_resident, tq1, tq2):
    if emit_weights:
        (e1_out_ref, e2_out_ref, attn12_ref, attn21_ref,
         e1_sc, e2_sc, k12_sc, v12_sc, k21_sc, v21_sc) = outs_and_scratch
    else:
        (e1_out_ref, e2_out_ref,
         e1_sc, e2_sc, k12_sc, v12_sc, k21_sc, v21_sc) = outs_and_scratch
        attn12_ref = attn21_ref = None

    layer = pl.program_id(1)
    qb = pl.program_id(2)
    bf = jnp.bfloat16
    f32 = jnp.float32

    def w(ref, j):
        # weight stacks are (4L, D, D) resident (index layer*4+j) or a
        # streamed (4, D, D) per-layer block (index j).
        return ref[layer * 4 + j] if weights_resident else ref[j]

    # Load the pre-stack embeddings into the resident f32 state once per batch.
    @pl.when((layer == 0) & (qb == 0))
    def _():
        e1_sc[...] = e1_ref[...].astype(f32)
        e2_sc[...] = e2_ref[...].astype(f32)

    # Per-layer K/V precompute at query-block 0, before any row of this layer's
    # state has been overwritten (the in-place update below touches each row
    # block exactly once per layer, after reading it).
    @pl.when(qb == 0)
    def _():
        x1b = e1_sc[...].astype(bf)
        x2b = e2_sc[...].astype(bf)
        k12_sc[...] = jnp.dot(x2b, w(w12_ref, 1), preferred_element_type=f32).astype(bf)
        v12_sc[...] = jnp.dot(x2b, w(w12_ref, 2), preferred_element_type=f32).astype(bf)
        k21_sc[...] = jnp.dot(x1b, w(w21_ref, 1), preferred_element_type=f32).astype(bf)
        v21_sc[...] = jnp.dot(x1b, w(w21_ref, 2), preferred_element_type=f32).astype(bf)

    def _direction(tq, state_sc, w_ref, k_sc, v_sc, bias_ref, attn_ref, out_ref):
        off = pl.multiple_of(qb * tq, tq)
        xq = state_sc[pl.ds(off, tq), :]                       # (tq, D) f32, pre-layer
        q = jnp.dot(xq.astype(bf), w(w_ref, 0),                # 1/sqrt(D) folded in Wq
                    preferred_element_type=f32)
        s = lax.dot_general(q.astype(bf), k_sc[...],
                            dimension_numbers=(((1,), (1,)), ((), ())),
                            preferred_element_type=f32)
        s = s + bias_ref[...]                                  # (tq, Nkv)
        m = jnp.max(s, axis=-1, keepdims=True)
        p = jnp.exp(s - m)                                     # unnormalized probs
        inv = pl.reciprocal(jnp.sum(p, axis=-1, keepdims=True), approx=True)
        # Normalize AFTER the PV matmul: Nq*D multiplies instead of Nq*Nkv.
        ctx = jnp.dot(p.astype(bf), v_sc[...], preferred_element_type=f32) * inv
        new = xq + jnp.dot(ctx.astype(bf), w(w_ref, 3), preferred_element_type=f32)
        # In-place state carry to the next layer.
        state_sc[pl.ds(off, tq), :] = new
        if attn_ref is not None:
            attn_ref[...] = (p * inv).astype(attn_ref.dtype)
        # The output block is flushed on every (layer, qb) step anyway (its
        # block index changes each step), so write unconditionally; the last
        # layer's write is what lands in HBM.
        out_ref[...] = new.astype(out_ref.dtype)

    # dir 1->2: embed_1 queries, embed_2 keys/values, masked by mask2.
    _direction(tq1, e1_sc, w12_ref, k12_sc, v12_sc, bias2_ref, attn12_ref, e1_out_ref)
    # dir 2->1: embed_2 queries, embed_1 keys/values, masked by mask1.
    _direction(tq2, e2_sc, w21_ref, k21_sc, v21_sc, bias1_ref, attn21_ref, e2_out_ref)


# ----------------------------------------------------------------------------
# Parameter init + packing + stacked forward.
# ----------------------------------------------------------------------------
def init_stacked_params(key, num_layers, d_model):
    """Deterministic per-layer f32 weights for both attention directions."""
    params = []
    scale = 1.0 / np.sqrt(d_model)
    for _ in range(num_layers):
        layer = {}
        for direction in ("dir12", "dir21"):
            ws = []
            for _ in range(4):  # Wq, Wk, Wv, Wo
                key, sub = jax.random.split(key)
                ws.append(jax.random.normal(sub, (d_model, d_model),
                                            dtype=jnp.float32) * scale)
            layer[direction] = tuple(ws)
        params.append(layer)
    return params


def pack_params(params, d_model):
    """Pack per-layer weights into (4L, D, D) bf16 stacks (layer-major q,k,v,o)."""
    qscale = jnp.float32(1.0 / np.sqrt(d_model))   # folded into Wq
    w12_l, w21_l = [], []
    for layer in params:
        w1q, w1k, w1v, w1o = layer["dir12"]        # queries from embed_1
        w2q, w2k, w2v, w2o = layer["dir21"]        # queries from embed_2
        w12_l += [w1q * qscale, w1k, w1v, w1o]
        w21_l += [w2q * qscale, w2k, w2v, w2o]
    w12 = jnp.stack(w12_l).astype(jnp.bfloat16)    # (4L, D, D)
    w21 = jnp.stack(w21_l).astype(jnp.bfloat16)    # (4L, D, D)
    return w12, w21


def stacked_cross_attention_forward(params, embed_1, embed_2, mask1, mask2,
                                    return_weights=True, q_block=256,
                                    attn_dtype=jnp.bfloat16,
                                    weights_resident=None):
    """Mirrors StackedCrossAttentionModule.forward (one fused pallas_call)."""
    B, N1, D = embed_1.shape
    _, N2, _ = embed_2.shape
    L = len(params)
    w12, w21 = pack_params(params, D)

    # ---- query-block tiling: bounds live score tiles to (tq, Nkv) ----------
    nq = max(1, _cdiv(N1, q_block), _cdiv(N2, q_block))

    def _tile(n):
        if nq == 1:
            return n, n
        t = _round_up(_cdiv(n, nq), 8)             # sublane-aligned query tiles
        return t, t * nq

    tq1, N1p = _tile(N1)
    tq2, N2p = _tile(N2)
    # For best attn-writeback bandwidth pick q_block so N1p/N2p end up as
    # multiples of 128 (lane-dense stores); padded key rows are masked below.

    f32 = jnp.float32
    e1p = embed_1 if N1p == N1 else jnp.pad(embed_1, ((0, 0), (0, N1p - N1), (0, 0)))
    e2p = embed_2 if N2p == N2 else jnp.pad(embed_2, ((0, 0), (0, N2p - N2), (0, 0)))
    m1p = mask1.astype(f32)
    m2p = mask2.astype(f32)
    if N1p != N1:
        m1p = jnp.pad(m1p, ((0, 0), (0, N1p - N1)))
    if N2p != N2:
        m2p = jnp.pad(m2p, ((0, 0), (0, N2p - N2)))
    # additive key-mask biases (0 valid, -1e9 padded/masked), shape (B, 1, N)
    bias1 = (1.0 - m1p)[:, None, :] * f32(-1e9)
    bias2 = (1.0 - m2p)[:, None, :] * f32(-1e9)

    # ---- weight residency decision + explicit VMEM budget ------------------
    vmem_cap = _vmem_capacity_bytes()
    w_bytes = (w12.size + w21.size) * 2            # bf16
    if weights_resident is None:
        weights_resident = w_bytes <= vmem_cap // 4

    ebytes = jnp.dtype(embed_1.dtype).itemsize
    abytes = jnp.dtype(attn_dtype).itemsize
    state_b = (N1p + N2p) * D * 4                                # f32 state
    kv_b = 2 * (N1p + N2p) * D * 2                               # bf16 K/V scratch
    in_b = 2 * ((N1p + N2p) * D * ebytes + (N1p + N2p) * 4)      # dbl-buffered inputs
    wv_b = w_bytes if weights_resident else 2 * (8 * D * D * 2)  # resident vs streamed
    out_b = 2 * (tq1 + tq2) * D * ebytes
    attn_b = (2 * (tq1 * N2p + tq2 * N1p) * abytes) if return_weights else 0
    live_b = 6 * (tq1 * N2p + tq2 * N1p) * 4                     # live f32 score tiles
    vmem_limit = int(min(max(int(1.5 * (state_b + kv_b + in_b + wv_b + out_b
                                        + attn_b + live_b)) + (4 << 20),
                             32 << 20), vmem_cap))

    flops = 2 * L * B * (4 * (N1p + N2p) * D * D + 4 * N1p * N2p * D)
    transc = 2 * L * B * N1p * N2p
    bytes_acc = (2 * B * (N1p + N2p) * D * ebytes + w_bytes
                 + (2 * L * B * N1p * N2p * abytes if return_weights else 0))
    cost = pl.CostEstimate(flops=flops, transcendentals=transc,
                           bytes_accessed=bytes_acc)

    # ---- specs --------------------------------------------------------------
    if weights_resident:
        w_spec = pl.BlockSpec((4 * L, D, D), lambda b, l, q: (0, 0, 0))
    else:
        w_spec = pl.BlockSpec((4, D, D), lambda b, l, q: (l, 0, 0))

    in_specs = [
        pl.BlockSpec((None, N1p, D), lambda b, l, q: (b, 0, 0)),    # embed_1
        pl.BlockSpec((None, N2p, D), lambda b, l, q: (b, 0, 0)),    # embed_2
        pl.BlockSpec((None, 1, N1p), lambda b, l, q: (b, 0, 0)),    # bias1
        pl.BlockSpec((None, 1, N2p), lambda b, l, q: (b, 0, 0)),    # bias2
        w_spec,                                                     # w12
        w_spec,                                                     # w21
    ]

    out_shapes = [jax.ShapeDtypeStruct((B, N1p, D), embed_1.dtype),
                  jax.ShapeDtypeStruct((B, N2p, D), embed_2.dtype)]
    out_specs = [pl.BlockSpec((None, tq1, D), lambda b, l, q: (b, q, 0)),
                 pl.BlockSpec((None, tq2, D), lambda b, l, q: (b, q, 0))]
    if return_weights:
        out_shapes += [jax.ShapeDtypeStruct((L, B, N1p, N2p), attn_dtype),
                       jax.ShapeDtypeStruct((L, B, N2p, N1p), attn_dtype)]
        out_specs += [pl.BlockSpec((None, None, tq1, N2p), lambda b, l, q: (l, b, q, 0)),
                      pl.BlockSpec((None, None, tq2, N1p), lambda b, l, q: (l, b, q, 0))]

    scratch_shapes = [
        pltpu.VMEM((N1p, D), jnp.float32),     # e1 state (carried across layers)
        pltpu.VMEM((N2p, D), jnp.float32),     # e2 state
        pltpu.VMEM((N2p, D), jnp.bfloat16),    # k12  (from embed_2)
        pltpu.VMEM((N2p, D), jnp.bfloat16),    # v12
        pltpu.VMEM((N1p, D), jnp.bfloat16),    # k21  (from embed_1)
        pltpu.VMEM((N1p, D), jnp.bfloat16),    # v21
    ]

    kernel = functools.partial(_stacked_kernel,
                               emit_weights=return_weights,
                               weights_resident=weights_resident,
                               tq1=tq1, tq2=tq2)

    results = pl.pallas_call(
        kernel,
        out_shape=tuple(out_shapes),
        grid=(B, L, nq),
        in_specs=in_specs,
        out_specs=tuple(out_specs),
        scratch_shapes=scratch_shapes,
        compiler_params=pltpu.CompilerParams(
            dimension_semantics=("parallel", "arbitrary", "arbitrary"),
            vmem_limit_bytes=vmem_limit),
        cost_estimate=cost,
    )(e1p, e2p, bias1, bias2, w12, w21)

    if return_weights:
        e1o, e2o, a12, a21 = results
    else:
        e1o, e2o = results
    if N1p != N1:
        e1o = e1o[:, :N1]
    if N2p != N2:
        e2o = e2o[:, :N2]
    if not return_weights:
        return e1o, e2o
    if N1p != N1 or N2p != N2:
        a12 = a12[:, :, :N1, :N2]
        a21 = a21[:, :, :N2, :N1]
    attn_weights = [(a12[l], a21[l]) for l in range(L)]
    return e1o, e2o, attn_weights


# ----------------------------------------------------------------------------
# Pure-JAX reference (same bf16-operand / f32-accumulate numerics policy).
# ----------------------------------------------------------------------------
def _ref_direction(xq, xkv, mask_kv, wq, wk, wv, wo):
    bf, f32 = jnp.bfloat16, jnp.float32
    qscale = jnp.float32(1.0 / np.sqrt(xq.shape[-1]))
    wq_b = (wq * qscale).astype(bf)
    wk_b, wv_b, wo_b = wk.astype(bf), wv.astype(bf), wo.astype(bf)
    q = jnp.einsum("bnd,de->bne", xq.astype(bf), wq_b, preferred_element_type=f32)
    k = jnp.einsum("bnd,de->bne", xkv.astype(bf), wk_b, preferred_element_type=f32)
    v = jnp.einsum("bnd,de->bne", xkv.astype(bf), wv_b, preferred_element_type=f32)
    s = jnp.einsum("bqd,bkd->bqk", q.astype(bf), k.astype(bf),
                   preferred_element_type=f32)
    s = s + (1.0 - mask_kv.astype(f32))[:, None, :] * jnp.float32(-1e9)
    attn = jax.nn.softmax(s, axis=-1)
    ctx = jnp.einsum("bqk,bkd->bqd", attn.astype(bf), v.astype(bf),
                     preferred_element_type=f32)
    out = xq + jnp.einsum("bqd,de->bqe", ctx.astype(bf), wo_b,
                          preferred_element_type=f32)
    return out, attn


def _ref_forward(params, e1, e2, m1, m2):
    weights = []
    for layer in params:
        n1, a12 = _ref_direction(e1, e2, m2, *layer["dir12"])
        n2, a21 = _ref_direction(e2, e1, m1, *layer["dir21"])
        e1, e2 = n1, n2
        weights.append((a12, a21))
    return e1, e2, weights


if __name__ == "__main__":
    # ---- Test 1: single query block, resident weights ----------------------
    B, N1, N2, D = 2, 8, 8, 32
    NUM_LAYERS = 3

    key = jax.random.PRNGKey(0)
    k1, k2, kp = jax.random.split(key, 3)
    embed_1 = jax.random.normal(k1, (B, N1, D), dtype=jnp.float32)
    embed_2 = jax.random.normal(k2, (B, N2, D), dtype=jnp.float32)
    mask1 = jnp.ones((B, N1), dtype=jnp.float32).at[:, -1].set(0.0)
    mask2 = jnp.ones((B, N2), dtype=jnp.float32).at[:, -1].set(0.0)
    params = init_stacked_params(kp, NUM_LAYERS, D)

    out1, out2, attn_weights = stacked_cross_attention_forward(
        params, embed_1, embed_2, mask1, mask2, return_weights=True)
    out1 = jax.block_until_ready(out1)
    out2 = jax.block_until_ready(out2)
    for a12, a21 in attn_weights:
        jax.block_until_ready(a12)
        jax.block_until_ready(a21)

    r1, r2, rw = _ref_forward(params, embed_1, embed_2, mask1, mask2)
    np.testing.assert_allclose(np.asarray(out1), np.asarray(r1), rtol=2e-2, atol=2e-2)
    np.testing.assert_allclose(np.asarray(out2), np.asarray(r2), rtol=2e-2, atol=2e-2)
    np.testing.assert_allclose(np.asarray(attn_weights[-1][0].astype(jnp.float32)),
                               np.asarray(rw[-1][0]), atol=2e-2)
    np.testing.assert_allclose(np.asarray(attn_weights[-1][1].astype(jnp.float32)),
                               np.asarray(rw[-1][1]), atol=2e-2)

    # return_weights=False path (no O(N^2) attention outputs).
    o1_nw, o2_nw = stacked_cross_attention_forward(
        params, embed_1, embed_2, mask1, mask2, return_weights=False)
    o1_nw = jax.block_until_ready(o1_nw)
    o2_nw = jax.block_until_ready(o2_nw)
    np.testing.assert_allclose(np.asarray(o1_nw), np.asarray(out1),
                               rtol=1e-5, atol=1e-5)
    np.testing.assert_allclose(np.asarray(o2_nw), np.asarray(out2),
                               rtol=1e-5, atol=1e-5)

    # ---- Test 2: multi query block + row padding + streamed weights --------
    B2, M1, M2, D2, L2 = 2, 24, 16, 32, 2
    ka, kb, kc = jax.random.split(jax.random.PRNGKey(1), 3)
    ea = jax.random.normal(ka, (B2, M1, D2), dtype=jnp.float32)
    eb = jax.random.normal(kb, (B2, M2, D2), dtype=jnp.float32)
    ma = jnp.ones((B2, M1), dtype=jnp.float32).at[:, -2:].set(0.0)
    mb = jnp.ones((B2, M2), dtype=jnp.float32).at[:, -1:].set(0.0)
    params2 = init_stacked_params(kc, L2, D2)

    p1, p2, pw = stacked_cross_attention_forward(
        params2, ea, eb, ma, mb, return_weights=True, q_block=8,
        weights_resident=False)
    p1 = jax.block_until_ready(p1)
    p2 = jax.block_until_ready(p2)

    q1, q2, qw = _ref_forward(params2, ea, eb, ma, mb)
    np.testing.assert_allclose(np.asarray(p1), np.asarray(q1), rtol=2e-2, atol=2e-2)
    np.testing.assert_allclose(np.asarray(p2), np.asarray(q2), rtol=2e-2, atol=2e-2)
    np.testing.assert_allclose(np.asarray(pw[-1][0].astype(jnp.float32)),
                               np.asarray(qw[-1][0]), atol=2e-2)
    np.testing.assert_allclose(np.asarray(pw[-1][1].astype(jnp.float32)),
                               np.asarray(qw[-1][1]), atol=2e-2)

    print("KERNEL_OK")
</pallas_src>

<mosaic_0001>
module attributes {stable_mosaic.version = 11 : i64} {
  func.func @_stacked_kernel(%arg0: i32, %arg1: i32, %arg2: i32, %arg3: memref<1x8x32xf32, #tpu.memory_space<vmem>>, %arg4: memref<1x8x32xf32, #tpu.memory_space<vmem>>, %arg5: memref<1x1x8xf32, #tpu.memory_space<vmem>>, %arg6: memref<1x1x8xf32, #tpu.memory_space<vmem>>, %arg7: memref<12x32x32xbf16, #tpu.memory_space<vmem>>, %arg8: memref<12x32x32xbf16, #tpu.memory_space<vmem>>, %arg9: memref<1x8x32xf32, #tpu.memory_space<vmem>>, %arg10: memref<1x8x32xf32, #tpu.memory_space<vmem>>, %arg11: memref<1x1x8x8xbf16, #tpu.memory_space<vmem>>, %arg12: memref<1x1x8x8xbf16, #tpu.memory_space<vmem>>, %arg13: memref<8x32xf32, #tpu.memory_space<vmem>>, %arg14: memref<8x32xf32, #tpu.memory_space<vmem>>, %arg15: memref<8x32xbf16, #tpu.memory_space<vmem>>, %arg16: memref<8x32xbf16, #tpu.memory_space<vmem>>, %arg17: memref<8x32xbf16, #tpu.memory_space<vmem>>, %arg18: memref<8x32xbf16, #tpu.memory_space<vmem>>) attributes {dimension_semantics = [#tpu.dimension_semantics<parallel>, #tpu.dimension_semantics<arbitrary>, #tpu.dimension_semantics<arbitrary>], iteration_bounds = array<i64: 2, 3, 1>, scalar_prefetch = 0 : i64, scratch_operands = 6 : i64, tpu.core_type = #tpu.core_type<tc>, window_params = [{transform_indices = @transform_0, window_bounds = array<i64: 1, 8, 32>}, {transform_indices = @transform_1, window_bounds = array<i64: 1, 8, 32>}, {transform_indices = @transform_2, window_bounds = array<i64: 1, 1, 8>}, {transform_indices = @transform_3, window_bounds = array<i64: 1, 1, 8>}, {pipeline_mode = #tpu.pipeline_mode<synchronous>, transform_indices = @transform_4, window_bounds = array<i64: 12, 32, 32>}, {pipeline_mode = #tpu.pipeline_mode<synchronous>, transform_indices = @transform_5, window_bounds = array<i64: 12, 32, 32>}, {transform_indices = @transform_6, window_bounds = array<i64: 1, 8, 32>}, {transform_indices = @transform_7, window_bounds = array<i64: 1, 8, 32>}, {transform_indices = @transform_8, window_bounds = array<i64: 1, 1, 8, 8>}, {transform_indices = @transform_9, window_bounds = array<i64: 1, 1, 8, 8>}]} {
    %c0_i32 = arith.constant 0 : i32
    %0 = arith.cmpi eq, %arg1, %c0_i32 : i32
    %c0_i32_0 = arith.constant 0 : i32
    %1 = arith.cmpi eq, %arg2, %c0_i32_0 : i32
    %2 = arith.andi %0, %1 : i1
    %3 = arith.extui %2 : i1 to i32
    %c0_i32_1 = arith.constant 0 : i32
    %4 = arith.cmpi ne, %3, %c0_i32_1 : i32
    scf.if %4 {
      %c0_61 = arith.constant 0 : index
      %c0_62 = arith.constant 0 : index
      %c0_63 = arith.constant 0 : index
      %108 = vector.load %arg3[%c0_61, %c0_62, %c0_63] : memref<1x8x32xf32, #tpu.memory_space<vmem>>, vector<1x8x32xf32>
      %109 = vector.shape_cast %108 : vector<1x8x32xf32> to vector<8x32xf32>
      %c0_64 = arith.constant 0 : index
      %c0_65 = arith.constant 0 : index
      %110 = vector.load %arg13[%c0_64, %c0_65] : memref<8x32xf32, #tpu.memory_space<vmem>>, vector<8x32xf32>
      tpu.vector_store %arg13[%c0_64, %c0_65], %109 {strides = array<i32>} : memref<8x32xf32, #tpu.memory_space<vmem>>, vector<8x32xf32>,
      %c0_66 = arith.constant 0 : index
      %c0_67 = arith.constant 0 : index
      %c0_68 = arith.constant 0 : index
      %111 = vector.load %arg4[%c0_66, %c0_67, %c0_68] : memref<1x8x32xf32, #tpu.memory_space<vmem>>, vector<1x8x32xf32>
      %112 = vector.shape_cast %111 : vector<1x8x32xf32> to vector<8x32xf32>
      %c0_69 = arith.constant 0 : index
      %c0_70 = arith.constant 0 : index
      %113 = vector.load %arg14[%c0_69, %c0_70] : memref<8x32xf32, #tpu.memory_space<vmem>>, vector<8x32xf32>
      tpu.vector_store %arg14[%c0_69, %c0_70], %112 {strides = array<i32>} : memref<8x32xf32, #tpu.memory_space<vmem>>, vector<8x32xf32>,
    } else {
    }
    %c0_i32_2 = arith.constant 0 : i32
    %5 = arith.cmpi eq, %arg2, %c0_i32_2 : i32
    %6 = arith.extui %5 : i1 to i32
    %c0_i32_3 = arith.constant 0 : i32
    %7 = arith.cmpi ne, %6, %c0_i32_3 : i32
    scf.if %7 {
      %c0_61 = arith.constant 0 : index
      %c0_62 = arith.constant 0 : index
      %108 = vector.load %arg13[%c0_61, %c0_62] : memref<8x32xf32, #tpu.memory_space<vmem>>, vector<8x32xf32>
      %109 = arith.truncf %108 : vector<8x32xf32> to vector<8x32xbf16>
      %c0_63 = arith.constant 0 : index
      %c0_64 = arith.constant 0 : index
      %110 = vector.load %arg14[%c0_63, %c0_64] : memref<8x32xf32, #tpu.memory_space<vmem>>, vector<8x32xf32>
      %111 = arith.truncf %110 : vector<8x32xf32> to vector<8x32xbf16>
      %c4_i32_65 = arith.constant 4 : i32
      %112 = arith.muli %arg1, %c4_i32_65 : i32
      %c1_i32 = arith.constant 1 : i32
      %113 = arith.addi %112, %c1_i32 : i32
      %114 = arith.index_cast %113 : i32 to index
      %c0_66 = arith.constant 0 : index
      %c0_67 = arith.constant 0 : index
      %115 = vector.load %arg7[%114, %c0_66, %c0_67] : memref<12x32x32xbf16, #tpu.memory_space<vmem>>, vector<1x32x32xbf16>
      %116 = vector.shape_cast %115 : vector<1x32x32xbf16> to vector<32x32xbf16>
      %cst_68 = arith.constant dense<0.000000e+00> : vector<8x32xf32>
      %117 = tpu.matmul %111, %116, %cst_68 {dimension_numbers = #tpu.dot_dimension_numbers<[1], [0], [0], [1], [0, 0, 1, 1], [], []>} : vector<8x32xbf16>, vector<32x32xbf16>, vector<8x32xf32> -> vector<8x32xf32>
      %118 = arith.truncf %117 : vector<8x32xf32> to vector<8x32xbf16>
      %c0_69 = arith.constant 0 : index
      %c0_70 = arith.constant 0 : index
      %119 = vector.load %arg15[%c0_69, %c0_70] : memref<8x32xbf16, #tpu.memory_space<vmem>>, vector<8x32xbf16>
      tpu.vector_store %arg15[%c0_69, %c0_70], %118 {strides = array<i32>} : memref<8x32xbf16, #tpu.memory_space<vmem>>, vector<8x32xbf16>,
      %c4_i32_71 = arith.constant 4 : i32
      %120 = arith.muli %arg1, %c4_i32_71 : i32
      %c2_i32 = arith.constant 2 : i32
      %121 = arith.addi %120, %c2_i32 : i32
      %122 = arith.index_cast %121 : i32 to index
      %c0_72 = arith.constant 0 : index
      %c0_73 = arith.constant 0 : index
      %123 = vector.load %arg7[%122, %c0_72, %c0_73] : memref<12x32x32xbf16, #tpu.memory_space<vmem>>, vector<1x32x32xbf16>
      %124 = vector.shape_cast %123 : vector<1x32x32xbf16> to vector<32x32xbf16>
      %cst_74 = arith.constant dense<0.000000e+00> : vector<8x32xf32>
      %125 = tpu.matmul %111, %124, %cst_74 {dimension_numbers = #tpu.dot_dimension_numbers<[1], [0], [0], [1], [0, 0, 1, 1], [], []>} : vector<8x32xbf16>, vector<32x32xbf16>, vector<8x32xf32> -> vector<8x32xf32>
      %126 = arith.truncf %125 : vector<8x32xf32> to vector<8x32xbf16>
      %c0_75 = arith.constant 0 : index
      %c0_76 = arith.constant 0 : index
      %127 = vector.load %arg16[%c0_75, %c0_76] : memref<8x32xbf16, #tpu.memory_space<vmem>>, vector<8x32xbf16>
      tpu.vector_store %arg16[%c0_75, %c0_76], %126 {strides = array<i32>} : memref<8x32xbf16, #tpu.memory_space<vmem>>, vector<8x32xbf16>,
      %c4_i32_77 = arith.constant 4 : i32
      %128 = arith.muli %arg1, %c4_i32_77 : i32
      %c1_i32_78 = arith.constant 1 : i32
      %129 = arith.addi %128, %c1_i32_78 : i32
      %130 = arith.index_cast %129 : i32 to index
      %c0_79 = arith.constant 0 : index
      %c0_80 = arith.constant 0 : index
      %131 = vector.load %arg8[%130, %c0_79, %c0_80] : memref<12x32x32xbf16, #tpu.memory_space<vmem>>, vector<1x32x32xbf16>
      %132 = vector.shape_cast %131 : vector<1x32x32xbf16> to vector<32x32xbf16>
      %cst_81 = arith.constant dense<0.000000e+00> : vector<8x32xf32>
      %133 = tpu.matmul %109, %132, %cst_81 {dimension_numbers = #tpu.dot_dimension_numbers<[1], [0], [0], [1], [0, 0, 1, 1], [], []>} : vector<8x32xbf16>, vector<32x32xbf16>, vector<8x32xf32> -> vector<8x32xf32>
      %134 = arith.truncf %133 : vector<8x32xf32> to vector<8x32xbf16>
      %c0_82 = arith.constant 0 : index
      %c0_83 = arith.constant 0 : index
      %135 = vector.load %arg17[%c0_82, %c0_83] : memref<8x32xbf16, #tpu.memory_space<vmem>>, vector<8x32xbf16>
      tpu.vector_store %arg17[%c0_82, %c0_83], %134 {strides = array<i32>} : memref<8x32xbf16, #tpu.memory_space<vmem>>, vector<8x32xbf16>,
      %c4_i32_84 = arith.constant 4 : i32
      %136 = arith.muli %arg1, %c4_i32_84 : i32
      %c2_i32_85 = arith.constant 2 : i32
      %137 = arith.addi %136, %c2_i32_85 : i32
      %138 = arith.index_cast %137 : i32 to index
      %c0_86 = arith.constant 0 : index
      %c0_87 = arith.constant 0 : index
      %139 = vector.load %arg8[%138, %c0_86, %c0_87] : memref<12x32x32xbf16, #tpu.memory_space<vmem>>, vector<1x32x32xbf16>
      %140 = vector.shape_cast %139 : vector<1x32x32xbf16> to vector<32x32xbf16>
      %cst_88 = arith.constant dense<0.000000e+00> : vector<8x32xf32>
      %141 = tpu.matmul %109, %140, %cst_88 {dimension_numbers = #tpu.dot_dimension_numbers<[1], [0], [0], [1], [0, 0, 1, 1], [], []>} : vector<8x32xbf16>, vector<32x32xbf16>, vector<8x32xf32> -> vector<8x32xf32>
      %142 = arith.truncf %141 : vector<8x32xf32> to vector<8x32xbf16>
      %c0_89 = arith.constant 0 : index
      %c0_90 = arith.constant 0 : index
      %143 = vector.load %arg18[%c0_89, %c0_90] : memref<8x32xbf16, #tpu.memory_space<vmem>>, vector<8x32xbf16>
      tpu.vector_store %arg18[%c0_89, %c0_90], %142 {strides = array<i32>} : memref<8x32xbf16, #tpu.memory_space<vmem>>, vector<8x32xbf16>,
    } else {
    }
    %c8_i32 = arith.constant 8 : i32
    %8 = arith.muli %arg2, %c8_i32 : i32
    %9 = tpu.assume_multiple %8, 8 : i32
    %10 = arith.index_cast %9 : i32 to index
    %c0 = arith.constant 0 : index
    %11 = vector.load %arg13[%10, %c0] : memref<8x32xf32, #tpu.memory_space<vmem>>, vector<8x32xf32>
    %12 = arith.truncf %11 : vector<8x32xf32> to vector<8x32xbf16>
    %c4_i32 = arith.constant 4 : i32
    %13 = arith.muli %arg1, %c4_i32 : i32
    %c0_i32_4 = arith.constant 0 : i32
    %14 = arith.addi %13, %c0_i32_4 : i32
    %15 = arith.index_cast %14 : i32 to index
    %c0_5 = arith.constant 0 : index
    %c0_6 = arith.constant 0 : index
    %16 = vector.load %arg7[%15, %c0_5, %c0_6] : memref<12x32x32xbf16, #tpu.memory_space<vmem>>, vector<1x32x32xbf16>
    %17 = vector.shape_cast %16 : vector<1x32x32xbf16> to vector<32x32xbf16>
    %cst = arith.constant dense<0.000000e+00> : vector<8x32xf32>
    %18 = tpu.matmul %12, %17, %cst {dimension_numbers = #tpu.dot_dimension_numbers<[1], [0], [0], [1], [0, 0, 1, 1], [], []>} : vector<8x32xbf16>, vector<32x32xbf16>, vector<8x32xf32> -> vector<8x32xf32>
    %19 = arith.truncf %18 : vector<8x32xf32> to vector<8x32xbf16>
    %c0_7 = arith.constant 0 : index
    %c0_8 = arith.constant 0 : index
    %20 = vector.load %arg15[%c0_7, %c0_8] : memref<8x32xbf16, #tpu.memory_space<vmem>>, vector<8x32xbf16>
    %cst_9 = arith.constant dense<0.000000e+00> : vector<8x8xf32>
    %21 = tpu.matmul %19, %20, %cst_9 {dimension_numbers = #tpu.dot_dimension_numbers<[1], [1], [0], [0], [0, 0, 1, 0], [], []>} : vector<8x32xbf16>, vector<8x32xbf16>, vector<8x8xf32> -> vector<8x8xf32>
    %c0_10 = arith.constant 0 : index
    %c0_11 = arith.constant 0 : index
    %c0_12 = arith.constant 0 : index
    %22 = vector.load %arg6[%c0_10, %c0_11, %c0_12] : memref<1x1x8xf32, #tpu.memory_space<vmem>>, vector<1x1x8xf32>
    %23 = vector.shape_cast %22 : vector<1x1x8xf32> to vector<1x8xf32>
    %24 = vector.broadcast %23 : vector<1x8xf32> to vector<8x8xf32>
    %25 = arith.addf %21, %24 : vector<8x8xf32>
    %cst_13 = arith.constant dense<0xFF800000> : vector<8xf32>
    %26 = vector.multi_reduction <maximumf>, %25, %cst_13 [1] : vector<8x8xf32> to vector<8xf32>
    %27 = vector.shape_cast %26 : vector<8xf32> to vector<8x1xf32>
    %28 = vector.broadcast %27 : vector<8x1xf32> to vector<8x8xf32>
    %29 = arith.subf %25, %28 : vector<8x8xf32>
    %30 = math.exp %29 : vector<8x8xf32>
    %cst_14 = arith.constant dense<0.000000e+00> : vector<8xf32>
    %31 = vector.multi_reduction <add>, %30, %cst_14 [1] : vector<8x8xf32> to vector<8xf32>
    %32 = vector.shape_cast %31 : vector<8xf32> to vector<8x1xf32>
    %33 = tpu.reciprocal %32 {approx = true} : vector<8x1xf32> -> vector<8x1xf32>
    %34 = arith.truncf %30 : vector<8x8xf32> to vector<8x8xbf16>
    %c0_15 = arith.constant 0 : index
    %c0_16 = arith.constant 0 : index
    %35 = vector.load %arg16[%c0_15, %c0_16] : memref<8x32xbf16, #tpu.memory_space<vmem>>, vector<8x32xbf16>
    %cst_17 = arith.constant dense<0.000000e+00> : vector<8x32xf32>
    %36 = tpu.matmul %34, %35, %cst_17 {dimension_numbers = #tpu.dot_dimension_numbers<[1], [0], [0], [1], [0, 0, 1, 1], [], []>} : vector<8x8xbf16>, vector<8x32xbf16>, vector<8x32xf32> -> vector<8x32xf32>
    %37 = vector.broadcast %33 : vector<8x1xf32> to vector<8x32xf32>
    %38 = arith.mulf %36, %37 : vector<8x32xf32>
    %39 = arith.truncf %38 : vector<8x32xf32> to vector<8x32xbf16>
    %c4_i32_18 = arith.constant 4 : i32
    %40 = arith.muli %arg1, %c4_i32_18 : i32
    %c3_i32 = arith.constant 3 : i32
    %41 = arith.addi %40, %c3_i32 : i32
    %42 = arith.index_cast %41 : i32 to index
    %c0_19 = arith.constant 0 : index
    %c0_20 = arith.constant 0 : index
    %43 = vector.load %arg7[%42, %c0_19, %c0_20] : memref<12x32x32xbf16, #tpu.memory_space<vmem>>, vector<1x32x32xbf16>
    %44 = vector.shape_cast %43 : vector<1x32x32xbf16> to vector<32x32xbf16>
    %cst_21 = arith.constant dense<0.000000e+00> : vector<8x32xf32>
    %45 = tpu.matmul %39, %44, %cst_21 {dimension_numbers = #tpu.dot_dimension_numbers<[1], [0], [0], [1], [0, 0, 1, 1], [], []>} : vector<8x32xbf16>, vector<32x32xbf16>, vector<8x32xf32> -> vector<8x32xf32>
    %46 = arith.addf %11, %45 : vector<8x32xf32>
    %47 = arith.index_cast %9 : i32 to index
    %c0_22 = arith.constant 0 : index
    %48 = vector.load %arg13[%47, %c0_22] : memref<8x32xf32, #tpu.memory_space<vmem>>, vector<8x32xf32>
    tpu.vector_store %arg13[%47, %c0_22], %46 {strides = array<i32>} : memref<8x32xf32, #tpu.memory_space<vmem>>, vector<8x32xf32>,
    %49 = vector.broadcast %33 : vector<8x1xf32> to vector<8x8xf32>
    %50 = arith.mulf %30, %49 : vector<8x8xf32>
    %51 = arith.truncf %50 : vector<8x8xf32> to vector<8x8xbf16>
    %c0_23 = arith.constant 0 : index
    %c0_24 = arith.constant 0 : index
    %c0_25 = arith.constant 0 : index
    %c0_26 = arith.constant 0 : index
    %52 = vector.load %arg11[%c0_23, %c0_24, %c0_25, %c0_26] : memref<1x1x8x8xbf16, #tpu.memory_space<vmem>>, vector<1x1x8x8xbf16>
    %53 = vector.shape_cast %52 : vector<1x1x8x8xbf16> to vector<8x8xbf16>
    %54 = vector.shape_cast %51 : vector<8x8xbf16> to vector<1x1x8x8xbf16>
    tpu.vector_store %arg11[%c0_23, %c0_24, %c0_25, %c0_26], %54 {strides = array<i32>} : memref<1x1x8x8xbf16, #tpu.memory_space<vmem>>, vector<1x1x8x8xbf16>,
    %c0_27 = arith.constant 0 : index
    %c0_28 = arith.constant 0 : index
    %c0_29 = arith.constant 0 : index
    %55 = vector.load %arg9[%c0_27, %c0_28, %c0_29] : memref<1x8x32xf32, #tpu.memory_space<vmem>>, vector<1x8x32xf32>
    %56 = vector.shape_cast %55 : vector<1x8x32xf32> to vector<8x32xf32>
    %57 = vector.shape_cast %46 : vector<8x32xf32> to vector<1x8x32xf32>
    tpu.vector_store %arg9[%c0_27, %c0_28, %c0_29], %57 {strides = array<i32>} : memref<1x8x32xf32, #tpu.memory_space<vmem>>, vector<1x8x32xf32>,
    %c8_i32_30 = arith.constant 8 : i32
    %58 = arith.muli %arg2, %c8_i32_30 : i32
    %59 = tpu.assume_multiple %58, 8 : i32
    %60 = arith.index_cast %59 : i32 to index
    %c0_31 = arith.constant 0 : index
    %61 = vector.load %arg14[%60, %c0_31] : memref<8x32xf32, #tpu.memory_space<vmem>>, vector<8x32xf32>
    %62 = arith.truncf %61 : vector<8x32xf32> to vector<8x32xbf16>
    %c4_i32_32 = arith.constant 4 : i32
    %63 = arith.muli %arg1, %c4_i32_32 : i32
    %c0_i32_33 = arith.constant 0 : i32
    %64 = arith.addi %63, %c0_i32_33 : i32
    %65 = arith.index_cast %64 : i32 to index
    %c0_34 = arith.constant 0 : index
    %c0_35 = arith.constant 0 : index
    %66 = vector.load %arg8[%65, %c0_34, %c0_35] : memref<12x32x32xbf16, #tpu.memory_space<vmem>>, vector<1x32x32xbf16>
    %67 = vector.shape_cast %66 : vector<1x32x32xbf16> to vector<32x32xbf16>
    %cst_36 = arith.constant dense<0.000000e+00> : vector<8x32xf32>
    %68 = tpu.matmul %62, %67, %cst_36 {dimension_numbers = #tpu.dot_dimension_numbers<[1], [0], [0], [1], [0, 0, 1, 1], [], []>} : vector<8x32xbf16>, vector<32x32xbf16>, vector<8x32xf32> -> vector<8x32xf32>
    %69 = arith.truncf %68 : vector<8x32xf32> to vector<8x32xbf16>
    %c0_37 = arith.constant 0 : index
    %c0_38 = arith.constant 0 : index
    %70 = vector.load %arg17[%c0_37, %c0_38] : memref<8x32xbf16, #tpu.memory_space<vmem>>, vector<8x32xbf16>
    %cst_39 = arith.constant dense<0.000000e+00> : vector<8x8xf32>
    %71 = tpu.matmul %69, %70, %cst_39 {dimension_numbers = #tpu.dot_dimension_numbers<[1], [1], [0], [0], [0, 0, 1, 0], [], []>} : vector<8x32xbf16>, vector<8x32xbf16>, vector<8x8xf32> -> vector<8x8xf32>
    %c0_40 = arith.constant 0 : index
    %c0_41 = arith.constant 0 : index
    %c0_42 = arith.constant 0 : index
    %72 = vector.load %arg5[%c0_40, %c0_41, %c0_42] : memref<1x1x8xf32, #tpu.memory_space<vmem>>, vector<1x1x8xf32>
    %73 = vector.shape_cast %72 : vector<1x1x8xf32> to vector<1x8xf32>
    %74 = vector.broadcast %73 : vector<1x8xf32> to vector<8x8xf32>
    %75 = arith.addf %71, %74 : vector<8x8xf32>
    %cst_43 = arith.constant dense<0xFF800000> : vector<8xf32>
    %76 = vector.multi_reduction <maximumf>, %75, %cst_43 [1] : vector<8x8xf32> to vector<8xf32>
    %77 = vector.shape_cast %76 : vector<8xf32> to vector<8x1xf32>
    %78 = vector.broadcast %77 : vector<8x1xf32> to vector<8x8xf32>
    %79 = arith.subf %75, %78 : vector<8x8xf32>
    %80 = math.exp %79 : vector<8x8xf32>
    %cst_44 = arith.constant dense<0.000000e+00> : vector<8xf32>
    %81 = vector.multi_reduction <add>, %80, %cst_44 [1] : vector<8x8xf32> to vector<8xf32>
    %82 = vector.shape_cast %81 : vector<8xf32> to vector<8x1xf32>
    %83 = tpu.reciprocal %82 {approx = true} : vector<8x1xf32> -> vector<8x1xf32>
    %84 = arith.truncf %80 : vector<8x8xf32> to vector<8x8xbf16>
    %c0_45 = arith.constant 0 : index
    %c0_46 = arith.constant 0 : index
    %85 = vector.load %arg18[%c0_45, %c0_46] : memref<8x32xbf16, #tpu.memory_space<vmem>>, vector<8x32xbf16>
    %cst_47 = arith.constant dense<0.000000e+00> : vector<8x32xf32>
    %86 = tpu.matmul %84, %85, %cst_47 {dimension_numbers = #tpu.dot_dimension_numbers<[1], [0], [0], [1], [0, 0, 1, 1], [], []>} : vector<8x8xbf16>, vector<8x32xbf16>, vector<8x32xf32> -> vector<8x32xf32>
    %87 = vector.broadcast %83 : vector<8x1xf32> to vector<8x32xf32>
    %88 = arith.mulf %86, %87 : vector<8x32xf32>
    %89 = arith.truncf %88 : vector<8x32xf32> to vector<8x32xbf16>
    %c4_i32_48 = arith.constant 4 : i32
    %90 = arith.muli %arg1, %c4_i32_48 : i32
    %c3_i32_49 = arith.constant 3 : i32
    %91 = arith.addi %90, %c3_i32_49 : i32
    %92 = arith.index_cast %91 : i32 to index
    %c0_50 = arith.constant 0 : index
    %c0_51 = arith.constant 0 : index
    %93 = vector.load %arg8[%92, %c0_50, %c0_51] : memref<12x32x32xbf16, #tpu.memory_space<vmem>>, vector<1x32x32xbf16>
    %94 = vector.shape_cast %93 : vector<1x32x32xbf16> to vector<32x32xbf16>
    %cst_52 = arith.constant dense<0.000000e+00> : vector<8x32xf32>
    %95 = tpu.matmul %89, %94, %cst_52 {dimension_numbers = #tpu.dot_dimension_numbers<[1], [0], [0], [1], [0, 0, 1, 1], [], []>} : vector<8x32xbf16>, vector<32x32xbf16>, vector<8x32xf32> -> vector<8x32xf32>
    %96 = arith.addf %61, %95 : vector<8x32xf32>
    %97 = arith.index_cast %59 : i32 to index
    %c0_53 = arith.constant 0 : index
    %98 = vector.load %arg14[%97, %c0_53] : memref<8x32xf32, #tpu.memory_space<vmem>>, vector<8x32xf32>
    tpu.vector_store %arg14[%97, %c0_53], %96 {strides = array<i32>} : memref<8x32xf32, #tpu.memory_space<vmem>>, vector<8x32xf32>,
    %99 = vector.broadcast %83 : vector<8x1xf32> to vector<8x8xf32>
    %100 = arith.mulf %80, %99 : vector<8x8xf32>
    %101 = arith.truncf %100 : vector<8x8xf32> to vector<8x8xbf16>
    %c0_54 = arith.constant 0 : index
    %c0_55 = arith.constant 0 : index
    %c0_56 = arith.constant 0 : index
    %c0_57 = arith.constant 0 : index
    %102 = vector.load %arg12[%c0_54, %c0_55, %c0_56, %c0_57] : memref<1x1x8x8xbf16, #tpu.memory_space<vmem>>, vector<1x1x8x8xbf16>
    %103 = vector.shape_cast %102 : vector<1x1x8x8xbf16> to vector<8x8xbf16>
    %104 = vector.shape_cast %101 : vector<8x8xbf16> to vector<1x1x8x8xbf16>
    tpu.vector_store %arg12[%c0_54, %c0_55, %c0_56, %c0_57], %104 {strides = array<i32>} : memref<1x1x8x8xbf16, #tpu.memory_space<vmem>>, vector<1x1x8x8xbf16>,
    %c0_58 = arith.constant 0 : index
    %c0_59 = arith.constant 0 : index
    %c0_60 = arith.constant 0 : index
    %105 = vector.load %arg10[%c0_58, %c0_59, %c0_60] : memref<1x8x32xf32, #tpu.memory_space<vmem>>, vector<1x8x32xf32>
    %106 = vector.shape_cast %105 : vector<1x8x32xf32> to vector<8x32xf32>
    %107 = vector.shape_cast %96 : vector<8x32xf32> to vector<1x8x32xf32>
    tpu.vector_store %arg10[%c0_58, %c0_59, %c0_60], %107 {strides = array<i32>} : memref<1x8x32xf32, #tpu.memory_space<vmem>>, vector<1x8x32xf32>,
    return
  }
  func.func @transform_0(%arg0: i32, %arg1: i32, %arg2: i32) -> (i32, i32, i32) {
    %c0_i32 = arith.constant 0 : i32
    %c0_i32_0 = arith.constant 0 : i32
    %c0_i32_1 = arith.constant 0 : i32
    return %arg0, %c0_i32, %c0_i32_0 : i32, i32, i32
  }
  func.func @transform_1(%arg0: i32, %arg1: i32, %arg2: i32) -> (i32, i32, i32) {
    %c0_i32 = arith.constant 0 : i32
    %c0_i32_0 = arith.constant 0 : i32
    %c0_i32_1 = arith.constant 0 : i32
    return %arg0, %c0_i32, %c0_i32_0 : i32, i32, i32
  }
  func.func @transform_2(%arg0: i32, %arg1: i32, %arg2: i32) -> (i32, i32, i32) {
    %c0_i32 = arith.constant 0 : i32
    %c0_i32_0 = arith.constant 0 : i32
    %c0_i32_1 = arith.constant 0 : i32
    return %arg0, %c0_i32, %c0_i32_0 : i32, i32, i32
  }
  func.func @transform_3(%arg0: i32, %arg1: i32, %arg2: i32) -> (i32, i32, i32) {
    %c0_i32 = arith.constant 0 : i32
    %c0_i32_0 = arith.constant 0 : i32
    %c0_i32_1 = arith.constant 0 : i32
    return %arg0, %c0_i32, %c0_i32_0 : i32, i32, i32
  }
  func.func @transform_4(%arg0: i32, %arg1: i32, %arg2: i32) -> (i32, i32, i32) {
    %c0_i32 = arith.constant 0 : i32
    %c0_i32_0 = arith.constant 0 : i32
    %c0_i32_1 = arith.constant 0 : i32
    %c0_i32_2 = arith.constant 0 : i32
    return %c0_i32, %c0_i32_0, %c0_i32_1 : i32, i32, i32
  }
  func.func @transform_5(%arg0: i32, %arg1: i32, %arg2: i32) -> (i32, i32, i32) {
    %c0_i32 = arith.constant 0 : i32
    %c0_i32_0 = arith.constant 0 : i32
    %c0_i32_1 = arith.constant 0 : i32
    %c0_i32_2 = arith.constant 0 : i32
    return %c0_i32, %c0_i32_0, %c0_i32_1 : i32, i32, i32
  }
  func.func @transform_6(%arg0: i32, %arg1: i32, %arg2: i32) -> (i32, i32, i32) {
    %c0_i32 = arith.constant 0 : i32
    %c0_i32_0 = arith.constant 0 : i32
    return %arg0, %arg2, %c0_i32 : i32, i32, i32
  }
  func.func @transform_7(%arg0: i32, %arg1: i32, %arg2: i32) -> (i32, i32, i32) {
    %c0_i32 = arith.constant 0 : i32
    %c0_i32_0 = arith.constant 0 : i32
    return %arg0, %arg2, %c0_i32 : i32, i32, i32
  }
  func.func @transform_8(%arg0: i32, %arg1: i32, %arg2: i32) -> (i32, i32, i32, i32) {
    %c0_i32 = arith.constant 0 : i32
    %c0_i32_0 = arith.constant 0 : i32
    return %arg1, %arg0, %arg2, %c0_i32 : i32, i32, i32, i32
  }
  func.func @transform_9(%arg0: i32, %arg1: i32, %arg2: i32) -> (i32, i32, i32, i32) {
    %c0_i32 = arith.constant 0 : i32
    %c0_i32_0 = arith.constant 0 : i32
    return %arg1, %arg0, %arg2, %c0_i32 : i32, i32, i32, i32
  }
}

</mosaic_0001>

<bundles_post_ra>
// kernel: tpu_custom_call.1
= control target key start
LH: loop header
LB: loop body
LE: loop exit
PB: predicated region body
PF: predicated region fallthrough
CT: control target
= control target key end

     0   :  { %s3055_s0 = inlined_call_operand.hbm [shape: f32[2,8,32], index: 0, kind: input, shape index: {}]   ;;  %s3056_s1 = inlined_call_operand.hbm [shape: f32[2,8,32], index: 1, kind: input, shape index: {}]   ;;  %s3057_s2 = inlined_call_operand.vmem [shape: f32[2,1,8], index: 2, kind: input, shape index: {}]   ;;  %s3058_s3 = inlined_call_operand.vmem [shape: f32[2,1,8], index: 3, kind: input, shape index: {}]   ;;  %s3059_s4 = inlined_call_operand.hbm [shape: bf16[12,32,32], index: 4, kind: input, shape index: {}]   ;;  %s3060_s5 = inlined_call_operand.hbm [shape: bf16[12,32,32], index: 5, kind: input, shape index: {}]   ;;  %s3061_s6 = inlined_call_operand.hbm [shape: f32[2,8,32], index: 6, kind: output, shape index: {0}]   ;;  %s3062_s7 = inlined_call_operand.hbm [shape: f32[2,8,32], index: 7, kind: output, shape index: {1}]   ;;  %s3063_s8 = inlined_call_operand.hbm [shape: bf16[3,2,8,8], index: 8, kind: output, shape index: {2}]   ;;  %s3064_s9 = inlined_call_operand.hbm [shape: bf16[3,2,8,8], index: 9, kind: output, shape index: {3}]  }
   0x1   :  { %3090 = sst [smem:[#allocation40_spill]] %s3055_s0 }
   0x2   :  { %3091 = sst [smem:[#allocation41_spill]] %s3058_s3 }
   0x3   :  { %3092 = sst [smem:[#allocation42_spill]] %s3059_s4 }
   0x4   :  { %3093 = sst [smem:[#allocation43_spill]] %s3060_s5 }
   0x5   :  { %3094 = sst [smem:[#allocation44_spill]] %s3061_s6 }
   0x6   :  { %3095 = sst [smem:[#allocation45_spill]] %s3062_s7 }
   0x7   :  { %3096 = sst [smem:[#allocation46_spill]] %s3063_s8 }
   0x8   :  { %3097 = sst [smem:[#allocation47_spill]] %s3064_s9 }
   0x9   :  { %15 = vsyncpa [#allocation9], 0 }
   0xa   :  { %17 = vsyncpa [#allocation9 + $0x1], 0 }
   0xb   :  { %18 = vsyncpa [#allocation12], 0 }
   0xc   :  { %20 = vsyncpa [#allocation12 + $0x1], 0 }
   0xd   :  { %21 = vsyncpa [#allocation15], 0 }
   0xe   :  { %22 = vsyncpa [#allocation10], 0 }
   0xf   :  { %24 = vsyncpa [#allocation10 + $0x1], 0 }
  0x10   :  { %25 = vsyncpa [#allocation18], 0 }
  0x11   :  { %27 = vsyncpa [#allocation18 + $0x1], 0 }
  0x12   :  { %28 = vsyncpa [#allocation21], 0 }
  0x13   :  { %30 = vsyncpa [#allocation21 + $0x1], 0  ;;  %s2440_s30 = smov 0   ;;  %s2442_s10 = smov 0  }
  0x14   :  { %s2444_s11 = smov 0   ;;  %s2446_s12 = smov 0  }
  0x15   :  { %s2448_s13 = smov 0   ;;  %s2450_s14 = smov 0  }
  0x16   :  { %s2452_s15 = smov 0   ;;  %s2454_s16 = smov 0  }
  0x17   :  { %s2456_s17 = smov 0   ;;  %s2458_s18 = smov 0  }
  0x18   :  { %s2460_s19 = smov 0  }
  0x19 LB: > { %3098 = sst [smem:[#allocation30_spill]] %s2336_s30  ;;  %s2496_s20 = sadd.s32 4294967295, %s2376_s19   ;;  %s2376_s19 = sphi %s2460_s19, %s36_s19   ;;  %s2372_s18 = sphi %s2458_s18, %s3154_s18   ;;  %s2368_s17 = sphi %s2456_s17, %s3153_s17   ;;  %s2364_s16 = sphi %s2454_s16, %s3152_s16   ;;  %s2360_s15 = sphi %s2452_s15, %s3151_s15   ;;  %s2356_s14 = sphi %s2450_s14, %s3160_s14   ;;  %s2352_s13 = sphi %s2448_s13, %s3159_s13   ;;  %s2348_s12 = sphi %s2446_s12, %s3158_s12   ;;  %s2344_s11 = sphi %s2444_s11, %s3157_s11   ;;  %s2340_s10 = sphi %s2442_s10, %s3156_s10   ;;  %s2336_s30 = sphi %s2440_s30, %s3155_s30  }
  0x1a   : > { %3099 = sst [smem:[#allocation31_spill]] %s2348_s12  ;;  %s3065_s21 = sadd.s32 4294967294, %s2376_s19  }
  0x1b   : > { %3100 = sst [smem:[#allocation32_spill]] %s2368_s17  ;;  %p75_p0 = scmp.ne.s32.totalorder %s2352_s13, %s2348_s12 }
  0x1c   : > { %3101 = sst [smem:[#allocation33_spill]] %s2372_s18  ;;  %p3073_p1 = scmp.eq.s32.totalorder %s2496_s20, 0 }
  0x1d   : > { %p3074_p2 = scmp.eq.s32.totalorder %s2496_s20, 5  ;;  %p227_p3 = scmp.eq.s32.totalorder %s3065_s21, 5 }
  0x1e   : > { %p2507_p4 = por %p3073_p1, %p75_p0  ;;  %p278_p5 = scmp.ne.s32.totalorder %s2344_s11, %s2340_s10 }
  0x1f   : > { %p2513_p6 = por %p227_p3, %p75_p0  ;;  %p284_p7 = scmp.ne.s32.totalorder %s2340_s10, %s2336_s30 }
  0x20   : > { %s3102_s22 = scalar_select %p2507_p4, 1, 0 }
  0x21   : > { %s3103_s23 = scalar_select %p2513_p6, 1, 0 }
  0x22   : > { %p2521_p8 = por %p278_p5, %p3074_p2  ;;  %p1629_p9 = scmp.ge.s32.totalorder %s2376_s19, 1 }
  0x23   : > { %3104 = sst [smem:[#allocation34_spill]] %s3103_s23  ;;  %p2526_p10 = por %p284_p7, %p227_p3 }
  0x24   : > { %s3105_s24 = scalar_select %p2521_p8, 1, 0 }
  0x25   : > { %s3107_s25 = scalar_select %p2526_p10, 1, 0 }
  0x26   : > { %3106 = sst [smem:[#allocation35_spill]] %s3105_s24  ;;  %p322_p11 = scmp.lt.s32.totalorder %s2376_s19, 7 }
  0x27   : > { %3108 = sst [smem:[#allocation36_spill]] %s3107_s25  ;;  %s2378_s27 = smov [#allocation13]  }
  0x28   : > { %p2531_p12 = pnand %p1629_p9, %p322_p11  ;;  %s334_s28 = sshll.u32 %s2378_s27, 4  ;;  %s335_s28 = int_to_ptr.vmem [resolvable:$true] %s334_s28 }
  0x29   : > { %s2379_s21 = smov [#allocation14]   ;;  %s3111_s4 = sld [smem:[#allocation42_spill]] }
  0x2a   : > { %s3109_s26 = scalar_select %p2531_p12, 1, 0 }
  0x2b   : > { %p1879_p13 = pneg %p2531_p12  ;;  %s347_s30 = sshll.u32 %s2379_s21, 4  ;;  %s2543_s30 = int_to_ptr.vmem [resolvable:$true] %s347_s30 }
  0x2d   : > { %p2539_p0 = pnand %p1879_p13, %p3073_p1 }
  0x2f   : > { %s2030_s12 = scalar_lea.hbm %s3111_s4, 3072  ;;  %p2032_p5 = pneg %p2539_p0 }
  0x30   : > { %p2031_p3 = scmp.ne.s32.totalorder %s3111_s4, %s2030_s12  ;;  %p2037_p11 = scmp.lt.u32.totalorder %s2030_s12, %s3111_s4 }
  0x32   : > { %p2033_p7 = pnand %p2032_p5, %p2031_p3 }
  0x34   : > { %p2034_p9 = pneg %p2033_p7 }
  0x36   : > { %p2039_p13 = pnand %p2037_p11, %p2034_p9 }
  0x38   : > { %2042 = shalt.err (!%p2039_p13)
}
  0x39   : > { %s2043_s21 = scalar_lea.vmem %s335_s28, 3072  ;;  %p2051_p6 = scmp.lt.s32.totalorder %s335_s28, %s335_s28 }
  0x3a   : > { %p2044_p1 = scmp.ne.s32.totalorder %s335_s28, %s2043_s21  ;;  %p2052_p8 = scmp.lt.s32.totalorder %s2043_s21, %s2043_s21 }
  0x3c   : > { %p2046_p2 = pnand %p2044_p1, %p2032_p5  ;;  %p2053_p4 = por %p2052_p8, %p2051_p6 }
  0x3e   : > { %p2047_p10 = pneg %p2046_p2 }
  0x40   : > { %p2054_p12 = pnand %p2053_p4, %p2047_p10 }
  0x42   : > { %2057 = shalt.err (!%p2054_p12)
}
  0x43   : > { %s2380_s8 = smov 64   ;;  %s2381_s23 = smov 4  }
  0x44   : > { %1882 = dma.hbm_to_vmem [thread:$0]  (!%p2539_p0), %s3111_s4, 3072, %s335_s28, [#allocation12], %s2380_s8, %s2380_s8, %s2381_s23  }
  0x45   : > { %s3112_s5 = sld [smem:[#allocation43_spill]] }
  0x4b   : > { %s2058_s27 = scalar_lea.hbm %s3112_s5, 3072 }
  0x4c   : > { %p2059_p1 = scmp.ne.s32.totalorder %s3112_s5, %s2058_s27  ;;  %p2065_p6 = scmp.lt.u32.totalorder %s2058_s27, %s3112_s5 }
  0x4e   : > { %p2061_p2 = pnand %p2059_p1, %p2032_p5 }
  0x50   : > { %p2062_p4 = pneg %p2061_p2 }
  0x52   : > { %p2067_p8 = pnand %p2065_p6, %p2062_p4 }
  0x54   : > { %2070 = shalt.err (!%p2067_p8)
}
  0x55   : > { %s2071_s28 = scalar_lea.vmem %s2543_s30, 3072  ;;  %p2079_p7 = scmp.lt.s32.totalorder %s2543_s30, %s2543_s30 }
  0x56   : > { %p2072_p10 = scmp.ne.s32.totalorder %s2543_s30, %s2071_s28  ;;  %p2080_p9 = scmp.lt.s32.totalorder %s2071_s28, %s2071_s28 }
  0x58   : > { %p2074_p12 = pnand %p2072_p10, %p2032_p5  ;;  %p2081_p11 = por %p2080_p9, %p2079_p7 }
  0x5a   : > { %p2075_p3 = pneg %p2074_p12 }
  0x5c   : > { %p2082_p13 = pnand %p2081_p11, %p2075_p3 }
  0x5e   : > { %2085 = shalt.err (!%p2082_p13)
}
  0x5f   : > { %1885 = dma.hbm_to_vmem [thread:$0]  (!%p2539_p0), %s3112_s5, 3072, %s2543_s30, [#allocation15], %s2380_s8, %s2380_s8, %s2381_s23  }
  0x60   : > { %s51_s24 = sadd.s32 1, %s2368_s17  ;;  %s55_s29 = sadd.s32 1, %s2372_s18 }
  0x61   : > { %p53_p5 = scmp.ge.s32.totalorder %s51_s24, 3  ;;  %s62_s7 = sadd.s32 1, %s2356_s14 }
  0x62   : > { %p69_p1 = scmp.ne.s32.totalorder %s2356_s14, %s2352_s13  ;;  %p70_p2 = scmp.eq.s32.totalorder %s2376_s19, 0 }
  0x63   : > { %s3162_s24 = smov (%p53_p5, %s51_s24), 0  ;;  %s3164_s29 = smov (!%p53_p5, %s55_s29), %s2372_s18 }
  0x64   : > { %3113 = sst [smem:[#allocation37_spill]] %s3162_s24  ;;  %p2601_p4 = por %p70_p2, %p69_p1 }
  0x65   : > { %p3115_p0 = scmp.eq.s32.totalorder %s2496_s20, 5  ;;  %p57_p8 = scmp.ge.s32.totalorder %s3164_s29, 2 }
  0x66   : > { %s261_s8 = ssub.s32 %s2368_s17, %s3162_s24  ;;  %s268_s23 = sadd.s32 1, %s2344_s11 }
  0x67   : > { %p2607_p6 = por %p3115_p0, %p69_p1  ;;  %p1908_p10 = scmp.lt.s32.totalorder %s2376_s19, 6 }
  0x68   : > { %s3166_s29 = smov (%p57_p8, %s3164_s29), 0  ;;  %s361_s12 = sand.u32 1, %s2356_s14  }
  0x69   : > { %s3116_s30 = scalar_select %p2607_p6, 1, 0 }
  0x6a   : > { %3117 = sst [smem:[#allocation38_spill]] %s3166_s29  ;;  %s1634_s25 = sshll.u32 %s2372_s18, 7 }
  0x6b   : > { %s59_s27 = ssub.s32 %s2372_s18, %s3166_s29  ;;  %s2621_s28 = sshll.u32 %s361_s12, 3 }
  0x6c   : > { %p60_p12 = scmp.eq.s32.totalorder %s59_s27, 0  ;;  %s263_s21 = sor.u32 %s261_s8, %s59_s27 }
  0x6d   : > { %p266_p3 = scmp.eq.s32.totalorder %s263_s21, 0  ;;  %s3119_s0 = sld [smem:[#allocation40_spill]] }
  0x6e   : > { %s2624_s3 = scalar_select %p60_p12, %s2356_s14, %s62_s7  }
  0x6f   : > { %s2627_s6 = scalar_select %p266_p3, %s2344_s11, %s268_s23  }
  0x70   : > { %3118 = sst [smem:[#allocation39_spill]] %s2624_s3  ;;  %s365_s29 = scalar_lea.vmem [#allocation8], %s2621_s28 }
  0x71   : > { %s372_s18 = sshll.u32 %s365_s29, 4  ;;  %p2639_p7 = pnand %p1908_p10, %p2601_p4  ;;  %s2643_s18 = int_to_ptr.vmem [resolvable:$true] %s372_s18 }
  0x72   : > { %s2648_s5 = scalar_lea.hbm %s3056_s1, %s1634_s25  ;;  %s362_s23 = scalar_lea.sflag [#allocation9], %s361_s12 }
  0x73   : > { %s2632_s24 = scalar_lea.hbm %s3119_s0, %s1634_s25  ;;  %p2088_p11 = pneg %p2639_p7 }
  0x74   : > { %s2086_s27 = scalar_lea.hbm %s2632_s24, 128  ;;  %s2091_s21 = scalar_lea.hbm %s3119_s0, 256 }
  0x75   : > { %p2087_p9 = scmp.ne.s32.totalorder %s2632_s24, %s2086_s27  ;;  %p2092_p1 = scmp.lt.u32.totalorder %s2632_s24, %s3119_s0 }
  0x76   : > { %p2093_p2 = scmp.lt.u32.totalorder %s2091_s21, %s2086_s27  ;;  %p2095_p0 = scmp.lt.u32.totalorder %s2086_s27, %s2632_s24 }
  0x77   : > { %p2089_p13 = pnand %p2088_p11, %p2087_p9 }
  0x78   : > { %p2094_p4 = por %p2093_p2, %p2092_p1 }
  0x79   : > { %p2090_p5 = pneg %p2089_p13 }
  0x7a   : > { %p2096_p8 = por %p2095_p0, %p2094_p4 }
  0x7c   : > { %p2097_p10 = pnand %p2096_p8, %p2090_p5 }
  0x7e   : > { %2100 = shalt.err (!%p2097_p10)
}
  0x7f   : > { %s2101_s12 = scalar_lea.vmem %s2643_s18, 128  ;;  %s2382_s25 = smov [#allocation8]  }
  0x80   : > { %p2102_p12 = scmp.ne.s32.totalorder %s2643_s18, %s2101_s12  ;;  %s2106_s7 = sshll.u32 %s2382_s25, 4  ;;  %s2107_s7 = int_to_ptr.vmem [resolvable:$false] %s2106_s7 }
  0x81   : > { %s2108_s17 = scalar_lea.vmem %s2107_s7, 256  ;;  %p2109_p13 = scmp.lt.s32.totalorder %s2643_s18, %s2107_s7 }
  0x82   : > { %p2104_p3 = pnand %p2102_p12, %p2088_p11  ;;  %p2110_p1 = scmp.lt.s32.totalorder %s2108_s17, %s2101_s12 }
  0x84   : > { %p2105_p9 = pneg %p2104_p3  ;;  %p2111_p2 = por %p2110_p1, %p2109_p13 }
  0x86   : > { %p2112_p4 = pnand %p2111_p2, %p2105_p9 }
  0x88   : > { %2115 = shalt.err (!%p2112_p4)
}
  0x89   : > { %1889 = dma.hbm_to_vmem [thread:$0]  (!%p2639_p7), %s2632_s24, 128, %s2643_s18, %s362_s23  }
  0x8a   : > { %s379_s3 = sand.u32 1, %s2376_s19   ;;  %s383_s4 = scalar_lea.vmem [#allocation11], %s2621_s28 }
  0x8b   : > { %s390_s27 = sshll.u32 %s383_s4, 4  ;;  %s380_s29 = scalar_lea.sflag [#allocation12], %s379_s3  ;;  %s391_s27 = int_to_ptr.vmem [resolvable:$true] %s390_s27 }
  0x8c   : > { %s2116_s9 = scalar_lea.hbm %s2648_s5, 128  ;;  %s2121_s25 = scalar_lea.hbm %s3056_s1, 256 }
  0x8d   : > { %p2117_p5 = scmp.ne.s32.totalorder %s2648_s5, %s2116_s9  ;;  %p2122_p10 = scmp.lt.u32.totalorder %s2648_s5, %s3056_s1 }
  0x8e   : > { %p2123_p12 = scmp.lt.u32.totalorder %s2121_s25, %s2116_s9  ;;  %p2125_p9 = scmp.lt.u32.totalorder %s2116_s9, %s2648_s5 }
  0x8f   : > { %p2119_p0 = pnand %p2117_p5, %p2088_p11 }
  0x90   : > { %p2124_p3 = por %p2123_p12, %p2122_p10 }
  0x91   : > { %p2120_p8 = pneg %p2119_p0 }
  0x92   : > { %p2126_p13 = por %p2125_p9, %p2124_p3 }
  0x94   : > { %p2127_p1 = pnand %p2126_p13, %p2120_p8 }
  0x96   : > { %2130 = shalt.err (!%p2127_p1)
}
  0x97   : > { %s2131_s18 = scalar_lea.vmem %s391_s27, 128  ;;  %s2383_s24 = smov [#allocation11]  }
  0x98   : > { %p2132_p2 = scmp.ne.s32.totalorder %s391_s27, %s2131_s18  ;;  %s2136_s28 = sshll.u32 %s2383_s24, 4  ;;  %s2137_s28 = int_to_ptr.vmem [resolvable:$false] %s2136_s28 }
  0x99   : > { %s2138_s23 = scalar_lea.vmem %s2137_s28, 256  ;;  %p2139_p0 = scmp.lt.s32.totalorder %s391_s27, %s2137_s28 }
  0x9a   : > { %p2134_p4 = pnand %p2132_p2, %p2088_p11  ;;  %p2140_p6 = scmp.lt.s32.totalorder %s2138_s23, %s2131_s18 }
  0x9c   : > { %p2135_p5 = pneg %p2134_p4  ;;  %p2141_p10 = por %p2140_p6, %p2139_p0 }
  0x9e   : > { %p2142_p12 = pnand %p2141_p10, %p2135_p5 }
  0xa0   : > { %2145 = shalt.err (!%p2142_p12)
}
  0xa1   : > { %1892 = dma.hbm_to_vmem [thread:$0]  (!%p2639_p7), %s2648_s5, 128, %s391_s27, %s380_s29  }
  0xa2   : > { %p3121_p8 = scmp.ne.s32.totalorder %s3109_s26, 0 }
  0xa3   : > { %s2699_s3 = sand.u32 (!%p3121_p8), 1, %s2352_s13   ;;  %p3122_p6 = scmp.ne.s32.totalorder (!%p3121_p8), %s3102_s22, 0 }
  0xa4   : > { %411 = sbr.rel (%p3121_p8) target bundleno = 1871 (0x74f), region = 44  ;;  %s2702_s4 = sshll.u32 (!%p3121_p8), %s2699_s3, 3 }
  0xa5   : > { %s414_s9 = scalar_lea.sflag (!%p3121_p8), [#allocation9], %s2699_s3  ;;  %s417_s21 = scalar_lea.vmem (!%p3121_p8), [#allocation8], %s2702_s4 }
  0xab   : > { %2303 = dma.done.wait (%p3122_p6), %s414_s9, 128  }
  0xac   : > { %2305 = vsyncadd (%p3122_p6), %s414_s9, 4294967168  ;;  %s3086_s26 = sand.u32 1, %s2496_s20   ;;  %s426_s5 = scalar_lea.vmem [#allocation11], %s2702_s4 }
  0xad   : > { %s423_s8 = scalar_lea.sflag [#allocation12], %s3086_s26 }
  0xae   : > { %2307 = dma.done.wait (%p3122_p6), %s423_s8, 128  }
  0xaf   : > { %2309 = vsyncadd (%p3122_p6), %s423_s8, 4294967168  ;;  %p3123_p7 = scmp.eq.s32.totalorder %s2496_s20, 0 }
  0xb1   : > { %2311 = dma.done.wait (%p3123_p7), [#allocation12], 3072   ;;  %p3124_p11 = pmov %p3123_p7 }
  0xb2   : > { %p3125_p3 = pmov %p3123_p7 }
  0xb3   : > { %2313 = vsyncadd (%p3124_p11), [#allocation12], 4294964224 }
  0xb4   : > { %2315 = dma.done.wait (%p3125_p3), [#allocation15], 3072   ;;  %p3126_p9 = pmov %p3125_p3 }
  0xb5   : > { %s3087_s22 = sand.u32 1, %s2340_s10   ;;  %p495_p13 = scmp.lt.s32.totalorder %s2364_s16, 1 }
  0xb6   : > { %2317 = vsyncadd (%p3126_p9), [#allocation15], 4294964224  ;;  %s2730_s27 = sshll.u32 %s3087_s22, 2  ;;  %p502_p1 = scmp.eq.s32.totalorder %s2360_s15, 0 }
  0xb7   : > { %s2734_s29 = scalar_select %p495_p13, %s2364_s16, 1 }
  0xb8   : > { %s3127_s24 = sld [smem:[#allocation41_spill]]  ;;  %s473_s23 = scalar_lea.vmem [#allocation16], %s2702_s4  ;;  %v508_v0 = vld [vmem:[%s417_s21] sm:$0xff] (%p502_p1)  ;;  %vm509_vm0 = vcmask (%p502_p1), 261120   ;;  %v511_v1 = vld [vmem:[%s426_s5] sm:$0xff] (%p502_p1) }
  0xb9   : > { %s497_s7 = scalar_lea.vmem %s3057_s2, %s2734_s29  ;;  %s3088_s8 = scalar_lea.vmem [#allocation19], %s2730_s27  ;;  %510 = vst.msk [vmem:[#allocation2] sm:$0xff] (%p502_p1), %vm509_vm0, %v508_v0  ;;  %512 = vst.msk [vmem:[#allocation3] sm:$0xff] (%p502_p1), %vm509_vm0, %v511_v1 }
  0xba   : > { %s494_s26 = scalar_lea.vmem [#allocation20], %s2730_s27  ;;  %507 = sbr.rel (!%p502_p1) target bundleno = 193 (0xc1), region = 64 }
  0xbe   : > { %s500_s28 = scalar_lea.vmem %s3127_s24, %s2734_s29 }
  0xc1 PF: > { %s1730_s22 = sshll.u32 %s2360_s15, 6  ;;  %v2384_v2 = vmov 0.0   ;;  %vm2385_vm1 = vmmov 0   ;;  %v2758_v4 = vld [vmem:[#allocation3] sm:$0xff]  ;;  %vm541_vm2 = vcmask 261120   ;;  %v2772_v10 = vld [vmem:[#allocation2] sm:$0xff] }
  0xc2   : > { %1771 = vmatprep.subr.bf16.mxu0 %v2384_v2  ;;  %1775 = vmatprep.mubr.msk.bf16.mxu0 %vm2385_vm1, %v2384_v2  ;;  %s2752_s12 = scalar_lea.vmem [#allocation13], %s1730_s22  ;;  %s2761_s21 = scalar_lea.vmem [#allocation14], %s1730_s22  ;;  %v2766_v6 = vpack.c.bf16 %v2758_v4, %v2758_v4  ;;  %v517_v13 = vpack.c.bf16 %v2772_v10, %v2772_v10  ;;  %vm586_vm3 = vcmask 257024   ;;  %vm912_vm4 = vcmask 1043456   ;;  %v1689_v46 = vld [vmem:[%s500_s28] ss:$0 sm:$0xff] }
  0xc3   : > { %v2006_v3 = vld [vmem:[%s2752_s12 + $0x10] sm:$0xff]   ;;  %1779 = vmatprep.subr.bf16.mxu1 %v2384_v2  ;;  %1783 = vmatprep.mubr.msk.bf16.mxu1 %vm2385_vm1, %v2384_v2  ;;  %v2007_v5 = vld [vmem:[%s2752_s12 + $0x18] sm:$0xff]   ;;  %v2012_v8 = vld [vmem:[%s2752_s12 + $0x20] sm:$0xff]   ;;  %vm896_vm5 = vcmask 64512   ;;  %vm1025_vm6 = vcmask 60416   ;;  %s3089_s29 = sshll.u32 %s2364_s16, 7 }
  0xc4   : > { %1772 = vmatpush3.bf16.msra.mxu0 %v2006_v3  ;;  %v2008_v7 = vld [vmem:[%s2761_s21 + $0x10] sm:$0xff]   ;;  %v2009_v9 = vld [vmem:[%s2761_s21 + $0x18] sm:$0xff]   ;;  %1780 = vmatpush3.bf16.msra.mxu1 %v2012_v8  ;;  %v2013_v11 = vld [vmem:[%s2752_s12 + $0x28] sm:$0xff]   ;;  %s1304_s22 = sshll.u32 %s473_s23, 4  ;;  %s1275_s17 = scalar_lea.sflag [#allocation10], %s2699_s3  ;;  %s2882_s22 = int_to_ptr.vmem [resolvable:$true] %s1304_s22 }
  0xc5   : > { %1773 = vmatprep.subr.bf16.mxu0 %v2384_v2  ;;  %1781 = vmatprep.subr.bf16.mxu1 %v2384_v2  ;;  %v2014_v12 = vld [vmem:[%s2761_s21 + $0x20] sm:$0xff]   ;;  %v2011_v15 = vld [vmem:[%s2752_s12 + $0x8] sm:$0xff]   ;;  %v2018_v63 = vld [vmem:[%s2752_s12 + $0x30] sm:$0xff]   ;;  %s2146_s18 = scalar_lea.vmem %s2882_s22, 128  ;;  %p3131_p4 = scmp.ne.s32.totalorder %s3116_s30, 0 }
  0xc6   : > { %v2010_v14 = vld [vmem:[%s2752_s12] sm:$0xff]   ;;  %v2015_v16 = vld [vmem:[%s2761_s21 + $0x28] sm:$0xff]   ;;  %v2019_v0 = vld [vmem:[%s2752_s12 + $0x38] sm:$0xff]   ;;  %s3129_s12 = sld [smem:[#allocation44_spill]]  ;;  %p2147_p2 = scmp.ne.s32.totalorder %s2882_s22, %s2146_s18 }
  0xc7   : > { %v2016_v57 = vld [vmem:[%s2761_s21] sm:$0xff]   ;;  %v2017_v60 = vld [vmem:[%s2761_s21 + $0x8] sm:$0xff]  }
  0xc8   : > { %1774 = vmatpush3.bf16.msra.mxu0 %v2007_v5  ;;  %1782 = vmatpush3.bf16.msra.mxu1 %v2013_v11  ;;  %p2148_p5 = pnand %p2147_p2, %p3131_p4 }
  0xc9   : > { %1787 = vmatprep.subr.bf16.mxu0 %v2384_v2  ;;  %1795 = vmatprep.subr.bf16.mxu1 %v2384_v2 }
  0xca   : > { %p2149_p0 = pneg %p2148_p5 }
  0xcb   : > { %1776 = vmatmul.mubr.msk.bf16.vlgmr.msra.gmra.mrb[0].mxu0 %vm541_vm2, %v2766_v6  ;;  %1784 = vmatmul.mubr.msk.bf16.vlgmr.msra.gmra.mrb[0].mxu1 %vm541_vm2, %v2766_v6 }
  0xcc   : > { %1788 = vmatpush3.bf16.msra.mxu0 %v2008_v7  ;;  %1791 = vmatprep.mubr.msk.bf16.mxu0 %vm2385_vm1, %v2384_v2  ;;  %s2878_s5 = scalar_lea.hbm %s3129_s12, %s3089_s29 }
  0xcd   : > { %1789 = vmatprep.subr.bf16.mxu0 %v2384_v2  ;;  %1796 = vmatpush3.bf16.msra.mxu1 %v2014_v12 }
  0xce   : > { %1799 = vmatprep.mubr.msk.bf16.mxu1 %vm2385_vm1, %v2384_v2  ;;  %1797 = vmatprep.subr.bf16.mxu1 %v2384_v2 }
  0xd0   : > { %1790 = vmatpush3.bf16.msra.mxu0 %v2009_v9 }
  0xd1   : > { %1803 = vmatprep.subr.bf16.mxu0 %v2384_v2  ;;  %1798 = vmatpush3.bf16.msra.mxu1 %v2015_v16 }
  0xd2   : > { %1811 = vmatprep.subr.bf16.mxu1 %v2384_v2 }
  0xd3   : > { %1792 = vmatmul.mubr.msk.bf16.vlgmr.msra.gmra.mrb[4].mxu0 %vm541_vm2, %v517_v13 }
  0xd4   : > { %1804 = vmatpush3.bf16.msra.mxu0 %v2010_v14  ;;  %1807 = vmatprep.mubr.msk.bf16.mxu0 %vm2385_vm1, %v2384_v2 }
  0xd5   : > { %1805 = vmatprep.subr.bf16.mxu0 %v2384_v2  ;;  %1800 = vmatmul.mubr.msk.bf16.vlgmr.msra.gmra.mrb[4].mxu1 %vm541_vm2, %v517_v13 }
  0xd6   : > { %1813 = vmatprep.mubr.msk.bf16.mxu1 %vm2385_vm1, %v2384_v2 }
  0xd8   : > { %1806 = vmatpush3.bf16.msra.mxu0 %v2011_v15 }
  0xd9   : > { %1817 = vmatprep.subr.bf16.mxu0 %v2384_v2 }
  0xdb   : > { %1808 = vmatmul.mubr.msk.bf16.vlgmr.msra.gmra.mrb[8].mxu0 %vm541_vm2, %v517_v13 }
  0xdc   : > { %1819 = vmatprep.mubr.msk.bf16.mxu0 %vm2385_vm1, %v2384_v2 }
 0x19e   : > { %v579_v17 = vpop.f32.mrb[0].mxu0  ;;  %v642_v22 = vpop.f32.mrb[0].mxu1 }
 0x19f   : > { %v585_v18 = vpack.c.bf16 %v579_v17, %v579_v17  ;;  %v1777_v19 = vpop.f32.mrb[1].mxu0  ;;  %v648_v23 = vpack.c.bf16 %v642_v22, %v642_v22  ;;  %v1785_v24 = vpop.f32.mrb[1].mxu1 }
 0x1a0   : > { %v582_v20 = vpop.f32.mrb[2].mxu0  ;;  %v645_v26 = vpop.f32.mrb[2].mxu1 }
 0x1a1   : > { %587 = vst.msk [vmem:[#allocation4] sm:$0xf] %vm586_vm3, %v585_v18  ;;  %v1778_v21 = vpop.f32.mrb[3].mxu0  ;;  %649 = vst.msk [vmem:[#allocation5] sm:$0xf] %vm586_vm3, %v648_v23  ;;  %v1786_v29 = vpop.f32.mrb[3].mxu1 }
 0x1a2   : > { %v1705_v26 = vld [vmem:[%s497_s7] ss:$0 sm:$0xff]  ;;  %s1723_s7 = sshll.u32 %s2360_s15, 1  ;;  %s2386_s15 = smov [#allocation16]  }
 0x1a3   : > { %s2885_s25 = sadd.s32 %s2364_s16, %s1723_s7 }
 0x1a6   : > { %v705_v25 = vpop.f32.mrb[4].mxu0 }
 0x1a7   : > { %v711_v27 = vpack.c.bf16 %v705_v25, %v705_v25  ;;  %v1793_v28 = vpop.f32.mrb[5].mxu0 }
 0x1a8   : > { %v708_v30 = vpop.f32.mrb[6].mxu0  ;;  %v842_v31 = vld [vmem:[#allocation4] sm:$0xf]  ;;  %v908_v35 = vld [vmem:[#allocation5] sm:$0xf]  ;;  %v765_v41 = vpop.f32.mrb[4].mxu1 }
 0x1a9   : > { %712 = vst.msk [vmem:[#allocation6] sm:$0xf] %vm586_vm3, %v711_v27  ;;  %v1794_v32 = vpop.f32.mrb[7].mxu0  ;;  %v854_v33 = vsel %vm541_vm2, %v842_v31, 0  ;;  %v914_v38 = vsel %vm912_vm4, %v908_v35, 0  ;;  %v771_v42 = vpack.c.bf16 %v765_v41, %v765_v41  ;;  %v1801_v43 = vpop.f32.mrb[5].mxu1 }
 0x1aa   : > { %1812 = vmatpush3.bf16.xpose.msra.mxu1 %v854_v33  ;;  %1818 = vmatpush3.bf16.msra.mxu0 %v914_v38  ;;  %v768_v44 = vpop.f32.mrb[6].mxu1  ;;  %v2020_v38 = vld [vmem:[%s2761_s21 + $0x30] sm:$0xff]  }
 0x1ab   : > { %1823 = vmatprep.subr.bf16.mxu1 %v2384_v2  ;;  %1831 = vmatprep.subr.bf16.mxu0 %v2384_v2  ;;  %772 = vst.msk [vmem:[#allocation7] sm:$0xf] %vm586_vm3, %v771_v42  ;;  %v1802_v45 = vpop.f32.mrb[7].mxu1 }
 0x1ae   : > { %v835_v34 = vpop.f32.mrb[8].mxu0 }
 0x1af   : > { %v841_v36 = vpack.c.bf16 %v835_v34, %v835_v34  ;;  %v1809_v37 = vpop.f32.mrb[9].mxu0 }
 0x1b0   : > { %v838_v39 = vpop.f32.mrb[10].mxu0  ;;  %v1093_v12 = vld [vmem:[#allocation6] sm:$0xf] }
 0x1b1   : > { %v1810_v40 = vpop.f32.mrb[11].mxu0  ;;  %1814 = vmatmul.mubr.msk.bf16.vlgmr.msra.gmra.mrb[8].mxu1 %vm541_vm2, %v841_v36  ;;  %v1105_v15 = vsel %vm541_vm2, %v1093_v12, 0  ;;  %v2021_v39 = vld [vmem:[%s2761_s21 + $0x38] sm:$0xff]   ;;  %s3130_s21 = smov %s3129_s12 }
 0x1b2   : > { %1827 = vmatprep.mubr.msk.bf16.mxu1 %vm2385_vm1, %v2384_v2  ;;  %v1158_v61 = vld [vmem:[#allocation7] sm:$0xf]  ;;  %1824 = vmatpush3.bf16.msra.mxu1 %v2018_v63 }
 0x1b3   : > { %v1163_v62 = vsel %vm912_vm4, %v1158_v61, 0  ;;  %1825 = vmatprep.subr.bf16.mxu1 %v2384_v2 }
 0x1b6   : > { %1826 = vmatpush3.bf16.msra.mxu1 %v2019_v0 }
 0x1b7   : > { %1839 = vmatprep.subr.bf16.mxu1 %v2384_v2 }
 0x284   : > { %v890_v47 = vpop.f32.mrb[8].mxu1 }
 0x285   : > { %v891_v48 = vadd.f32 %v1689_v46, %v890_v47  ;;  %v1815_v49 = vpop.f32.mrb[9].mxu1 }
 0x286   : > { %v893_v50 = vpop.f32.mrb[10].mxu1 }
 0x287   : > { %v1816_v51 = vpop.f32.mrb[11].mxu1  ;;  %v897_v52 = vsel %vm896_vm5, %v891_v48, -inf }
 0x288   : > { %898 = vmax.xlane.f32.xlu0 %v897_v52 }
 0x315   : > { %v899_v53 = vpop.xlane.xlu0 %898 }
 0x316   : > { %v900_v54 = vsub.f32 %v891_v48, %v899_v53 }
 0x318   : > { %v901_v55 = vmul.f32 1.442695, %v900_v54 }
 0x31a   : > { %2022 = vpow2.f32 %v901_v55 }
 0x324   : > { %v2023_v56 = vpop.eup %2022 }
 0x325   : > { %v903_v58 = vsel %vm896_vm5, %v2023_v56, 0.0  ;;  %v907_v59 = vpack.c.bf16 %v2023_v56, %v2023_v56 }
 0x326   : > { %904 = vadd.xlane.f32.xlu0 %v903_v58 }
 0x327   : > { %1820 = vmatmul.mubr.msk.bf16.vlgmr.msra.gmra.mrb[12].mxu0 %vm896_vm5, %v907_v59 }
 0x328   : > { %1832 = vmatpush3.bf16.msra.mxu0 %v2016_v57  ;;  %1835 = vmatprep.mubr.msk.bf16.mxu0 %vm2385_vm1, %v2384_v2 }
 0x329   : > { %1833 = vmatprep.subr.bf16.mxu0 %v2384_v2 }
 0x32c   : > { %1834 = vmatpush3.bf16.msra.mxu0 %v2017_v60 }
 0x32d   : > { %1845 = vmatprep.subr.bf16.mxu0 %v2384_v2 }
 0x32f   : > { %1836 = vmatmul.mubr.msk.bf16.vlgmr.msra.gmra.mrb[16].mxu0 %vm541_vm2, %v2766_v6 }
 0x330   : > { %1846 = vmatpush3.bf16.msra.mxu0 %v1163_v62  ;;  %1847 = vmatprep.mubr.msk.bf16.mxu0 %vm2385_vm1, %v2384_v2 }
 0x3b3   : > { %v905_v1 = vpop.xlane.xlu0 %904 }
 0x3b4   : > { %2024 = vrcp.f32 %v905_v1 }
 0x3be   : > { %v2025_v3 = vpop.eup %2024 }
 0x3bf   : > { %v1023_v5 = vmul.f32 %v2025_v3, %v2023_v56 }
 0x3c1   : > { %v1024_v6 = vpack.c.bf16 %v1023_v5, %v1023_v5 }
 0x3c3   : > { %1026 = vst.msk [vmem:[%s3088_s8] sm:$0xf] %vm1025_vm6, %v1024_v6  ;;  %s2150_s8 = sshll.u32 %s2386_s15, 4  ;;  %s2151_s8 = int_to_ptr.vmem [resolvable:$false] %s2150_s8 }
 0x3c4   : > { %s2152_s24 = scalar_lea.vmem %s2151_s8, 256  ;;  %p2153_p10 = scmp.lt.s32.totalorder %s2882_s22, %s2151_s8 }
 0x3c5   : > { %p2154_p12 = scmp.lt.s32.totalorder %s2152_s24, %s2146_s18 }
 0x3c7   : > { %p2155_p8 = por %p2154_p12, %p2153_p10 }
 0x3c9   : > { %p2156_p6 = pnand %p2155_p8, %p2149_p0 }
 0x3fa   : > { %v950_v7 = vpop.f32.mrb[12].mxu0 }
 0x3fb   : > { %v956_v8 = vmul.f32 %v2025_v3, %v950_v7  ;;  %v1821_v9 = vpop.f32.mrb[13].mxu0 }
 0x3fc   : > { %v953_v11 = vpop.f32.mrb[14].mxu0 }
 0x3fd   : > { %v957_v13 = vpack.c.bf16 %v956_v8, %v956_v8  ;;  %v1822_v14 = vpop.f32.mrb[15].mxu0 }
 0x3ff   : > { %1828 = vmatmul.mubr.msk.bf16.vlgmr.msra.gmra.mrb[12].mxu1 %vm541_vm2, %v957_v13 }
 0x400   : > { %1840 = vmatpush3.bf16.xpose.msra.mxu1 %v1105_v15  ;;  %1841 = vmatprep.mubr.msk.bf16.mxu1 %vm2385_vm1, %v2384_v2 }
 0x401   : > { %1851 = vmatprep.subr.bf16.mxu1 %v2384_v2 }
 0x402   : > { %v1086_v16 = vpop.f32.mrb[16].mxu0 }
 0x403   : > { %v1092_v17 = vpack.c.bf16 %v1086_v16, %v1086_v16  ;;  %v1837_v18 = vpop.f32.mrb[17].mxu0 }
 0x404   : > { %v1089_v19 = vpop.f32.mrb[18].mxu0 }
 0x405   : > { %v1838_v20 = vpop.f32.mrb[19].mxu0 }
 0x407   : > { %1842 = vmatmul.mubr.msk.bf16.vlgmr.msra.gmra.mrb[16].mxu1 %vm541_vm2, %v1092_v17 }
 0x408   : > { %1855 = vmatprep.mubr.msk.bf16.mxu1 %vm2385_vm1, %v2384_v2  ;;  %1852 = vmatpush3.bf16.msra.mxu1 %v2020_v38 }
 0x409   : > { %1853 = vmatprep.subr.bf16.mxu1 %v2384_v2 }
 0x40c   : > { %1854 = vmatpush3.bf16.msra.mxu1 %v2021_v39 }
 0x4d2   : > { %v1015_v21 = vpop.f32.mrb[12].mxu1 }
 0x4d3   : > { %v1021_v22 = vadd.f32 %v1015_v21, %v2772_v10  ;;  %v1829_v23 = vpop.f32.mrb[13].mxu1 }
 0x4d4   : > { %v1018_v24 = vpop.f32.mrb[14].mxu1 }
 0x4d5   : > { %1022 = vst.msk [vmem:[#allocation2] sm:$0xff] %vm541_vm2, %v1021_v22  ;;  %1027 = vst.msk [vmem:[%s473_s23] sm:$0xff] %vm541_vm2, %v1021_v22  ;;  %v1830_v25 = vpop.f32.mrb[15].mxu1 }
 0x4da   : > { %v1141_v27 = vpop.f32.mrb[16].mxu1 }
 0x4db   : > { %v1142_v28 = vadd.f32 %v1705_v26, %v1141_v27  ;;  %v1843_v29 = vpop.f32.mrb[17].mxu1 }
 0x4dc   : > { %v1144_v30 = vpop.f32.mrb[18].mxu1 }
 0x4dd   : > { %v1844_v10 = vpop.f32.mrb[19].mxu1  ;;  %v1147_v31 = vsel %vm896_vm5, %v1142_v28, -inf }
 0x4de   : > { %1148 = vmax.xlane.f32.xlu1 %v1147_v31 }
 0x56b   : > { %v1149_v32 = vpop.xlane.xlu1 %1148 }
 0x56c   : > { %v1150_v33 = vsub.f32 %v1142_v28, %v1149_v32 }
 0x56e   : > { %v1151_v34 = vmul.f32 1.442695, %v1150_v33 }
 0x570   : > { %2026 = vpow2.f32 %v1151_v34 }
 0x57a   : > { %v2027_v35 = vpop.eup %2026 }
 0x57b   : > { %v1153_v36 = vsel %vm896_vm5, %v2027_v35, 0.0  ;;  %v1157_v37 = vpack.c.bf16 %v2027_v35, %v2027_v35 }
 0x57c   : > { %1154 = vadd.xlane.f32.xlu1 %v1153_v36 }
 0x57d   : > { %1848 = vmatmul.mubr.msk.bf16.vlgmr.msra.gmra.mrb[20].mxu0 %vm896_vm5, %v1157_v37 }
 0x609   : > { %v1155_v40 = vpop.xlane.xlu1 %1154 }
 0x60a   : > { %2028 = vrcp.f32 %v1155_v40 }
 0x614   : > { %v2029_v41 = vpop.eup %2028 }
 0x615   : > { %v1270_v42 = vmul.f32 %v2029_v41, %v2027_v35 }
 0x617   : > { %v1271_v43 = vpack.c.bf16 %v1270_v42, %v1270_v42 }
 0x619   : > { %1272 = vst.msk [vmem:[%s494_s26] sm:$0xf] %vm1025_vm6, %v1271_v43 }
 0x650   : > { %v1199_v44 = vpop.f32.mrb[20].mxu0 }
 0x651   : > { %v1205_v45 = vmul.f32 %v2029_v41, %v1199_v44  ;;  %v1849_v2 = vpop.f32.mrb[21].mxu0 }
 0x652   : > { %v1202_v46 = vpop.f32.mrb[22].mxu0 }
 0x653   : > { %v1206_v47 = vpack.c.bf16 %v1205_v45, %v1205_v45  ;;  %v1850_v48 = vpop.f32.mrb[23].mxu0 }
 0x655   : > { %1856 = vmatmul.mubr.msk.bf16.vlgmr.msra.gmra.mrb[20].mxu1 %vm541_vm2, %v1206_v47 }
 0x656   : > { %2159 = shalt.err (!%p2156_p6)
}
 0x657   : > { %s2160_s3 = scalar_lea.hbm %s2878_s5, 128  ;;  %s2164_s28 = scalar_lea.hbm %s3130_s21, 256 }
 0x658   : > { %p2161_p7 = scmp.ne.s32.totalorder %s2878_s5, %s2160_s3  ;;  %p2165_p9 = scmp.lt.u32.totalorder %s2878_s5, %s3130_s21 }
 0x659   : > { %p2166_p13 = scmp.lt.u32.totalorder %s2164_s28, %s2160_s3  ;;  %p2168_p2 = scmp.lt.u32.totalorder %s2160_s3, %s2878_s5 }
 0x65a   : > { %p2162_p11 = pnand %p2161_p7, %p3131_p4 }
 0x65b   : > { %p2167_p1 = por %p2166_p13, %p2165_p9 }
 0x65c   : > { %p2163_p3 = pneg %p2162_p11 }
 0x65d   : > { %p2169_p5 = por %p2168_p2, %p2167_p1 }
 0x65f   : > { %p2170_p0 = pnand %p2169_p5, %p2163_p3 }
 0x661   : > { %2173 = shalt.err (!%p2170_p0)
}
 0x662   : > { %s3132_s18 = sld [smem:[#allocation35_spill]]  ;;  %s1724_s15 = sshll.u32 %s2885_s25, 6 }
 0x663   : > { %1871 = dma.vmem_to_hbm [thread:$0]  (%p3131_p4), %s2882_s22, 128, %s2878_s5, %s1275_s17  }
 0x664   : > { %s3133_s7 = sld [smem:[#allocation47_spill]]  ;;  %s1350_s3 = sshll.u32 %s494_s26, 4  ;;  %s1351_s3 = int_to_ptr.vmem [resolvable:$true] %s1350_s3 }
 0x665   : > { %s3134_s12 = sand.u32 1, %s2340_s10   ;;  %s2174_s29 = scalar_lea.vmem %s1351_s3, 64 }
 0x666   : > { %s1290_s8 = scalar_lea.sflag [#allocation21], %s3134_s12  ;;  %p2175_p10 = scmp.ne.s32.totalorder %s1351_s3, %s2174_s29 }
 0x667   : > { %s2387_s9 = smov [#allocation20]  }
 0x668   : > { %p3135_p12 = scmp.ne.s32.totalorder %s3132_s18, 0  ;;  %s2178_s0 = sshll.u32 %s2387_s9, 4  ;;  %s2179_s0 = int_to_ptr.vmem [resolvable:$false] %s2178_s0 }
 0x669   : > { %s2180_s5 = scalar_lea.vmem %s2179_s0, 128  ;;  %p2181_p7 = scmp.lt.s32.totalorder %s1351_s3, %s2179_s0 }
 0x66a   : > { %s2915_s28 = scalar_lea.hbm %s3133_s7, %s1724_s15  ;;  %p2176_p8 = pnand %p2175_p10, %p3135_p12 }
 0x66b   : > { %p2182_p11 = scmp.lt.s32.totalorder %s2180_s5, %s2174_s29 }
 0x66c   : > { %p2177_p6 = pneg %p2176_p8 }
 0x66d   : > { %p2183_p3 = por %p2182_p11, %p2181_p7 }
 0x66f   : > { %p2184_p9 = pnand %p2183_p3, %p2177_p6 }
 0x671   : > { %2187 = shalt.err (!%p2184_p9)
}
 0x672   : > { %s2188_s26 = scalar_lea.hbm %s2915_s28, 64  ;;  %s2192_s9 = scalar_lea.hbm %s3133_s7, 384 }
 0x673   : > { %p2189_p13 = scmp.ne.s32.totalorder %s2915_s28, %s2188_s26  ;;  %p2193_p5 = scmp.lt.u32.totalorder %s2915_s28, %s3133_s7 }
 0x674   : > { %p2194_p0 = scmp.lt.u32.totalorder %s2192_s9, %s2188_s26  ;;  %p2196_p8 = scmp.lt.u32.totalorder %s2188_s26, %s2915_s28 }
 0x675   : > { %p2190_p1 = pnand %p2189_p13, %p3135_p12 }
 0x676   : > { %p2195_p10 = por %p2194_p0, %p2193_p5 }
 0x677   : > { %p2191_p2 = pneg %p2190_p1 }
 0x678   : > { %p2197_p6 = por %p2196_p8, %p2195_p10 }
 0x67a   : > { %p2198_p7 = pnand %p2197_p6, %p2191_p2 }
 0x67c   : > { %2201 = shalt.err (!%p2198_p7)
}
 0x67d   : > { %1874 = dma.vmem_to_hbm [thread:$0]  (%p3135_p12), %s1351_s3, 64, %s2915_s28, %s1290_s8  }
 0x67e   : > { %s3136_s29 = scalar_lea.vmem [#allocation17], %s2702_s4  ;;  %s3137_s12 = scalar_lea.vmem [#allocation19], %s2730_s27 }
 0x67f   : > { %s1318_s23 = sshll.u32 %s3136_s29, 4  ;;  %s1334_s5 = sshll.u32 %s3137_s12, 4  ;;  %s2950_s23 = int_to_ptr.vmem [resolvable:$true] %s1318_s23  ;;  %s2959_s5 = int_to_ptr.vmem [resolvable:$true] %s1334_s5 }
 0x680   : > { %s3138_s26 = sshll.u32 %s2364_s16, 7  ;;  %s3139_s9 = sld [smem:[#allocation45_spill]] }
 0x681   : > { %s3140_s3 = sld [smem:[#allocation46_spill]]  ;;  %s3141_s16 = smov %s3136_s29 }
 0x682   : > { %s3142_s0 = sand.u32 1, %s2496_s20   ;;  %s2202_s12 = scalar_lea.vmem %s2950_s23, 128 }
 0x683   : > { %s2967_s29 = scalar_lea.sflag [#allocation18], %s3142_s0  ;;  %p2203_p11 = scmp.ne.s32.totalorder %s2950_s23, %s2202_s12 }
 0x684   : > { %s2388_s25 = smov [#allocation17]  }
 0x685   : > { %p2204_p3 = pnand %p2203_p11, %p3131_p4 }
 0x686   : > { %s2948_s24 = scalar_lea.hbm %s3139_s9, %s3138_s26  ;;  %s2206_s26 = sshll.u32 %s2388_s25, 4  ;;  %s2207_s26 = int_to_ptr.vmem [resolvable:$false] %s2206_s26 }
 0x687   : > { %s2957_s8 = scalar_lea.hbm %s3140_s3, %s1724_s15  ;;  %p2205_p9 = pneg %p2204_p3 }
 0x688   : > { %s2208_s15 = scalar_lea.vmem %s2207_s26, 256  ;;  %p2209_p13 = scmp.lt.s32.totalorder %s2950_s23, %s2207_s26 }
 0x689   : > { %p2210_p1 = scmp.lt.s32.totalorder %s2208_s15, %s2202_s12 }
 0x68b   : > { %p2211_p2 = por %p2210_p1, %p2209_p13 }
 0x68d   : > { %p2212_p5 = pnand %p2211_p2, %p2205_p9 }
 0x728   : > { %v1262_v49 = vpop.f32.mrb[20].mxu1 }
 0x729   : > { %v1268_v50 = vadd.f32 %v1262_v49, %v2758_v4  ;;  %v1857_v51 = vpop.f32.mrb[21].mxu1 }
 0x72a   : > { %v1265_v52 = vpop.f32.mrb[22].mxu1 }
 0x72b   : > { %1269 = vst.msk [vmem:[#allocation3] sm:$0xff] %vm541_vm2, %v1268_v50  ;;  %1273 = vst.msk [vmem:[%s3141_s16] sm:$0xff] %vm541_vm2, %v1268_v50  ;;  %v1858_v4 = vpop.f32.mrb[23].mxu1 }
 0x72c   : > { %2215 = shalt.err (!%p2212_p5)
}
 0x72d   : > { %s2216_s20 = scalar_lea.hbm %s2948_s24, 128  ;;  %s2220_s17 = scalar_lea.hbm %s3139_s9, 256 }
 0x72e   : > { %p2217_p0 = scmp.ne.s32.totalorder %s2948_s24, %s2216_s20  ;;  %p2221_p6 = scmp.lt.u32.totalorder %s2948_s24, %s3139_s9 }
 0x72f   : > { %p2222_p7 = scmp.lt.u32.totalorder %s2220_s17, %s2216_s20  ;;  %p2224_p3 = scmp.lt.u32.totalorder %s2216_s20, %s2948_s24 }
 0x730   : > { %p2218_p10 = pnand %p2217_p0, %p3131_p4 }
 0x731   : > { %p2223_p11 = por %p2222_p7, %p2221_p6 }
 0x732   : > { %p2219_p8 = pneg %p2218_p10 }
 0x733   : > { %p2225_p9 = por %p2224_p3, %p2223_p11 }
 0x735   : > { %p2226_p13 = pnand %p2225_p9, %p2219_p8 }
 0x737   : > { %2229 = shalt.err (!%p2226_p13)
}
 0x738   : > { %1872 = dma.vmem_to_hbm [thread:$0]  (%p3131_p4), %s2950_s23, 128, %s2948_s24, %s2967_s29  }
 0x739   : > { %s2230_s16 = scalar_lea.vmem %s2959_s5, 64  ;;  %s2389_s0 = smov [#allocation19]  }
 0x73a   : > { %p2231_p1 = scmp.ne.s32.totalorder %s2959_s5, %s2230_s16  ;;  %s2234_s12 = sshll.u32 %s2389_s0, 4  ;;  %s2235_s12 = int_to_ptr.vmem [resolvable:$false] %s2234_s12 }
 0x73b   : > { %s2236_s25 = scalar_lea.vmem %s2235_s12, 128  ;;  %p2237_p0 = scmp.lt.s32.totalorder %s2959_s5, %s2235_s12 }
 0x73c   : > { %p2232_p2 = pnand %p2231_p1, %p3135_p12  ;;  %p2238_p10 = scmp.lt.s32.totalorder %s2236_s25, %s2230_s16 }
 0x73e   : > { %p2233_p5 = pneg %p2232_p2  ;;  %p2239_p8 = por %p2238_p10, %p2237_p0 }
 0x740   : > { %p2240_p6 = pnand %p2239_p8, %p2233_p5 }
 0x742   : > { %2243 = shalt.err (!%p2240_p6)
}
 0x743   : > { %s2244_s30 = scalar_lea.hbm %s2957_s8, 64  ;;  %s2248_s26 = scalar_lea.hbm %s3140_s3, 384 }
 0x744   : > { %p2245_p4 = scmp.ne.s32.totalorder %s2957_s8, %s2244_s30  ;;  %p2249_p3 = scmp.lt.u32.totalorder %s2957_s8, %s3140_s3 }
 0x745   : > { %p2250_p9 = scmp.lt.u32.totalorder %s2248_s26, %s2244_s30  ;;  %p2252_p1 = scmp.lt.u32.totalorder %s2244_s30, %s2957_s8 }
 0x746   : > { %p2246_p7 = pnand %p2245_p4, %p3135_p12 }
 0x747   : > { %p2251_p13 = por %p2250_p9, %p2249_p3 }
 0x748   : > { %p2247_p11 = pneg %p2246_p7 }
 0x749   : > { %p2253_p2 = por %p2252_p1, %p2251_p13 }
 0x74b   : > { %p2254_p5 = pnand %p2253_p2, %p2247_p11 }
 0x74d   : > { %2257 = shalt.err (!%p2254_p5)
}
 0x74e   : > { %1873 = dma.vmem_to_hbm [thread:$0]  (%p3135_p12), %s2959_s5, 64, %s2957_s8, %s2967_s29  }
 0x74f PF: > { %s3143_s4 = sld [smem:[#allocation31_spill]]  ;;  %s3144_s22 = sld [smem:[#allocation34_spill]] }
 0x750   : > { %p1911_p0 = scmp.ge.s32.totalorder %s2376_s19, 2 }
 0x755   : > { %s1362_s17 = sand.u32 1, %s3143_s4   ;;  %p3145_p10 = scmp.ne.s32.totalorder %s3144_s22, 0 }
 0x756   : > { %s1363_s27 = scalar_lea.sflag [#allocation10], %s1362_s17 }
 0x757   : > { %p1894_p8 = pnand %p1911_p0, %p3145_p10 }
 0x759   : > { %2319 = dma.done.wait (!%p1894_p8), %s1363_s27, 128  }
 0x75a   : > { %2321 = vsyncadd (!%p1894_p8), %s1363_s27, 4294967168  ;;  %s3146_s28 = sadd.s32 4294967294, %s2376_s19  }
 0x75b   : > { %s1371_s16 = sand.u32 1, %s3146_s28  }
 0x75c   : > { %s1372_s0 = scalar_lea.sflag [#allocation18], %s1371_s16 }
 0x75d   : > { %2323 = dma.done.wait (!%p1894_p8), %s1372_s0, 128  }
 0x75e   : > { %2325 = vsyncadd (!%p1894_p8), %s1372_s0, 4294967168  ;;  %s3147_s18 = sld [smem:[#allocation36_spill]] }
 0x764   : > { %p3148_p6 = scmp.ne.s32.totalorder %s3147_s18, 0 }
 0x766   : > { %p1900_p12 = pnand %p1911_p0, %p3148_p6 }
 0x768   : > { %2327 = dma.done.wait (!%p1900_p12), %s1372_s0, 64  }
 0x769   : > { %2329 = vsyncadd (!%p1900_p12), %s1372_s0, 4294967232  ;;  %s3149_s5 = sld [smem:[#allocation30_spill]] }
 0x76f   : > { %s1389_s8 = sand.u32 1, %s3149_s5  }
 0x770   : > { %s1390_s29 = scalar_lea.sflag [#allocation21], %s1389_s8 }
 0x771   : > { %2331 = dma.done.wait (!%p1900_p12), %s1390_s29, 64  }
 0x772   : > { %2333 = vsyncadd (!%p1900_p12), %s1390_s29, 4294967232  ;;  %s36_s19 = sadd.s32 1, %s2376_s19   ;;  %s3150_s25 = sld [smem:[#allocation39_spill]] }
 0x773   : > { %p33_p4 = scmp.ge.s32.totalorder %s36_s19, 8   ;;  %s3151_s15 = sld [smem:[#allocation32_spill]] }
 0x774   : > { %s3152_s16 = sld [smem:[#allocation33_spill]]  ;;  %s3153_s17 = sld [smem:[#allocation37_spill]] }
 0x775   : > { %s3154_s18 = sld [smem:[#allocation38_spill]]  ;;  %s3155_s30 = smov %s2340_s10 }
 0x776   : > { %s3156_s10 = smov %s2344_s11  ;;  %s3157_s11 = smov %s2627_s6 }
 0x777   : > { %s3158_s12 = smov %s2352_s13  ;;  %s3159_s13 = smov %s2356_s14 }
 0x778   : > { %s3160_s14 = smov %s3150_s25  ;;  %35 = sbr.rel (!%p33_p4) target bundleno = 25 (0x19), region = 183 }
 0x77f   :  { %1395 = vsyncpa [#allocation9], 1 }
 0x780   :  { %1397 = vsyncpa [#allocation9 + $0x1], 1 }
 0x781   :  { %1398 = vsyncpa [#allocation12], 1 }
 0x782   :  { %1400 = vsyncpa [#allocation12 + $0x1], 1 }
 0x783   :  { %1401 = vsyncpa [#allocation15], 1 }
 0x784   :  { %1402 = vsyncpa [#allocation10], 1 }
 0x785   :  { %1404 = vsyncpa [#allocation10 + $0x1], 1 }
 0x786   :  { %1405 = vsyncpa [#allocation18], 1 }
 0x787   :  { %1407 = vsyncpa [#allocation18 + $0x1], 1 }
 0x788   :  { %1408 = vsyncpa [#allocation21], 1 }
 0x789   :  { %1410 = vsyncpa [#allocation21 + $0x1], 1 }

</bundles_post_ra>
